<compile_context>
chip_gen: v6e
topology: v6e:2x2x1
jax: 0.10.0
libtpu: 0.0.40
codegen_flags: <defaults>
</compile_context>

<pallas_src>
import functools

import jax
import jax.numpy as jnp
from jax import lax
from jax.experimental import pallas as pl
from jax.experimental.pallas import tpu as pltpu


def _block_attn_kernel(x_ref, o_ref, *, block_size, blocks_per_step,
                       num_full_blocks, inv_c, inv_bs):
    """One grid step = `blocks_per_step` consecutive blocks of rows.

    x_ref / o_ref: (blocks_per_step * block_size, feature_dim) VMEM tiles.
    Blocks whose global index >= num_full_blocks (the unprocessed partial tail
    and any out-of-range padding of the ragged last grid step) write zeros.
    """
    step = pl.program_id(0)
    out_dtype = o_ref.dtype

    def body(j, carry):
        b = step * blocks_per_step + j                 # global block index
        row0 = pl.multiple_of(j * block_size, block_size)

        x = x_ref[pl.ds(row0, block_size), :].astype(jnp.float32)

        # Squared pairwise distances via ||a||^2 + ||b||^2 - 2 a.b.
        # dot_general contracts the feature axis of x against itself, so no
        # transposed copy of x is materialized for the Gram matrix (MXU).
        gram = lax.dot_general(
            x, x,
            dimension_numbers=(((1,), (1,)), ((), ())),
            preferred_element_type=jnp.float32)                    # (B, B)
        sq = jnp.sum(x * x, axis=-1, keepdims=True)                # (B, 1)
        d2 = jnp.maximum(sq + sq.T - 2.0 * gram, 0.0)              # clamp cancellation

        w = jnp.exp(d2 * inv_c)                                    # (B, B) EUP exp

        out = jnp.dot(w, x, preferred_element_type=jnp.float32)    # (B, D) MXU
        out = out * inv_bs

        valid = b < num_full_blocks
        out = jnp.where(valid, out, 0.0)                           # tail -> zeros
        o_ref[pl.ds(row0, block_size), :] = out.astype(out_dtype)
        return carry

    lax.fori_loop(0, blocks_per_step, body, 0, unroll=True)


def block_self_attention(features, block_size=128, blocks_per_step=8):
    """JAX/Pallas equivalent of BlockSelfAttention.forward.

    features: (N, feature_dim). Rows beyond the last full block are zero in the
    output (matching the PyTorch reference, which never touches them).
    """
    n, d = features.shape
    num_full = n // block_size
    if num_full == 0:
        # The PyTorch loop never runs: output is all zeros.
        return jnp.zeros_like(features)
    if block_size % 8 != 0:
        raise ValueError("block_size must be a multiple of 8 for TPU sublane tiling")

    # Number of block-slots needed to cover all N rows (incl. the ragged tail).
    blocks_total = -(-n // block_size)
    # Batch G blocks per grid step; keep >= 2 grid steps whenever possible so
    # dimension_semantics=("parallel",) can shard across both v7x TensorCores.
    g = max(1, min(blocks_per_step, (blocks_total + 1) // 2))
    rows_per_step = g * block_size
    grid = (-(-blocks_total // g),)

    inv_c = -1.0 / (2.0 * (d / 10.0))   # Gaussian scale as a constant multiply
    inv_bs = 1.0 / block_size           # normalization as a constant multiply

    kernel = functools.partial(
        _block_attn_kernel,
        block_size=block_size,
        blocks_per_step=g,
        num_full_blocks=num_full,
        inv_c=inv_c,
        inv_bs=inv_bs,
    )

    return pl.pallas_call(
        kernel,
        out_shape=jax.ShapeDtypeStruct((n, d), features.dtype),
        grid_spec=pltpu.PrefetchScalarGridSpec(
            num_scalar_prefetch=0,
            grid=grid,
            in_specs=[pl.BlockSpec((rows_per_step, d), lambda i: (i, 0))],
            out_specs=pl.BlockSpec((rows_per_step, d), lambda i: (i, 0)),
        ),
        compiler_params=pltpu.CompilerParams(
            dimension_semantics=("parallel",),
        ),
    )(features)


def _reference(features, block_size, feature_dim):
    """Pure-JAX reference mirroring the PyTorch forward (for a sanity check)."""
    n, _ = features.shape
    num_blocks = n // block_size
    out = jnp.zeros_like(features)
    for i in range(num_blocks):
        s = i * block_size
        blk = features[s:s + block_size].astype(jnp.float32)
        diff = blk[:, None, :] - blk[None, :, :]
        d2 = jnp.sum(diff * diff, axis=-1)
        w = jnp.exp(-d2 / (2.0 * (feature_dim / 10.0)))
        out = out.at[s:s + block_size].set(
            (w @ blk / block_size).astype(features.dtype)
        )
    return out


if __name__ == "__main__":
    key = jax.random.PRNGKey(0)

    # Small shapes consistent with the module: N points, feature_dim features,
    # including a partial trailing block that must stay zero.
    feature_dim = 32
    block_size = 128
    n_points = 3 * block_size + 16

    features = jax.random.normal(key, (n_points, feature_dim), dtype=jnp.float32)

    out = block_self_attention(features, block_size=block_size)
    out = jax.block_until_ready(out)

    ref = _reference(features, block_size, feature_dim)
    assert out.shape == features.shape
    assert jnp.allclose(out, ref, atol=1e-4, rtol=1e-4), "mismatch vs reference"

    print("KERNEL_OK")
</pallas_src>

<mosaic_0001>
module attributes {stable_mosaic.version = 11 : i64} {
  func.func @_block_attn_kernel(%arg0: i32, %arg1: memref<256x32xf32, #tpu.memory_space<vmem>>, %arg2: memref<256x32xf32, #tpu.memory_space<vmem>>) attributes {dimension_semantics = [#tpu.dimension_semantics<parallel>], iteration_bounds = array<i64: 2>, scalar_prefetch = 0 : i64, scratch_operands = 0 : i64, tpu.core_type = #tpu.core_type<tc>, window_params = [{transform_indices = @transform_0, window_bounds = array<i64: 256, 32>}, {transform_indices = @transform_1, window_bounds = array<i64: 256, 32>}]} {
    %c0_i32 = arith.constant 0 : i32
    %c2_i32 = arith.constant 2 : i32
    %0 = arith.muli %arg0, %c2_i32 : i32
    %1 = arith.addi %0, %c0_i32 : i32
    %c128_i32 = arith.constant 128 : i32
    %2 = arith.muli %c0_i32, %c128_i32 : i32
    %3 = tpu.assume_multiple %2, 128 : i32
    %4 = arith.index_cast %3 : i32 to index
    %c0 = arith.constant 0 : index
    %5 = vector.load %arg1[%4, %c0] : memref<256x32xf32, #tpu.memory_space<vmem>>, vector<128x32xf32>
    %cst = arith.constant dense<0.000000e+00> : vector<128x128xf32>
    %6 = tpu.matmul %5, %5, %cst {dimension_numbers = #tpu.dot_dimension_numbers<[1], [1], [0], [0], [0, 0, 1, 0], [], []>} : vector<128x32xf32>, vector<128x32xf32>, vector<128x128xf32> -> vector<128x128xf32>
    %7 = arith.mulf %5, %5 : vector<128x32xf32>
    %cst_0 = arith.constant dense<0.000000e+00> : vector<128xf32>
    %8 = vector.multi_reduction <add>, %7, %cst_0 [1] : vector<128x32xf32> to vector<128xf32>
    %9 = vector.shape_cast %8 : vector<128xf32> to vector<128x1xf32>
    %10 = tpu.transpose %9, [1, 0] : vector<128x1xf32> -> vector<1x128xf32>
    %11 = vector.broadcast %9 : vector<128x1xf32> to vector<128x128xf32>
    %12 = vector.broadcast %10 : vector<1x128xf32> to vector<128x128xf32>
    %13 = arith.addf %11, %12 : vector<128x128xf32>
    %cst_1 = arith.constant 2.000000e+00 : f32
    %14 = vector.broadcast %cst_1 : f32 to vector<128x128xf32>
    %15 = arith.mulf %14, %6 : vector<128x128xf32>
    %16 = arith.subf %13, %15 : vector<128x128xf32>
    %cst_2 = arith.constant 0.000000e+00 : f32
    %17 = vector.broadcast %cst_2 : f32 to vector<128x128xf32>
    %18 = arith.maximumf %16, %17 : vector<128x128xf32>
    %cst_3 = arith.constant -1.562500e-01 : f32
    %19 = vector.broadcast %cst_3 : f32 to vector<128x128xf32>
    %20 = arith.mulf %18, %19 : vector<128x128xf32>
    %21 = math.exp %20 : vector<128x128xf32>
    %cst_4 = arith.constant dense<0.000000e+00> : vector<128x32xf32>
    %22 = tpu.matmul %21, %5, %cst_4 {dimension_numbers = #tpu.dot_dimension_numbers<[1], [0], [0], [1], [0, 0, 1, 1], [], []>} : vector<128x128xf32>, vector<128x32xf32>, vector<128x32xf32> -> vector<128x32xf32>
    %cst_5 = arith.constant 7.812500e-03 : f32
    %23 = vector.broadcast %cst_5 : f32 to vector<128x32xf32>
    %24 = arith.mulf %22, %23 : vector<128x32xf32>
    %c3_i32 = arith.constant 3 : i32
    %25 = arith.cmpi slt, %1, %c3_i32 : i32
    %cst_6 = arith.constant 0.000000e+00 : f32
    %26 = vector.broadcast %cst_6 : f32 to vector<128x32xf32>
    %27 = arith.select %25, %24, %26 : vector<128x32xf32>
    %28 = arith.index_cast %3 : i32 to index
    %c0_7 = arith.constant 0 : index
    %29 = vector.load %arg2[%28, %c0_7] : memref<256x32xf32, #tpu.memory_space<vmem>>, vector<128x32xf32>
    tpu.vector_store %arg2[%28, %c0_7], %27 {strides = array<i32>} : memref<256x32xf32, #tpu.memory_space<vmem>>, vector<128x32xf32>,
    %c1_i32 = arith.constant 1 : i32
    %c2_i32_8 = arith.constant 2 : i32
    %30 = arith.muli %arg0, %c2_i32_8 : i32
    %31 = arith.addi %30, %c1_i32 : i32
    %c128_i32_9 = arith.constant 128 : i32
    %32 = arith.muli %c1_i32, %c128_i32_9 : i32
    %33 = tpu.assume_multiple %32, 128 : i32
    %34 = arith.index_cast %33 : i32 to index
    %c0_10 = arith.constant 0 : index
    %35 = vector.load %arg1[%34, %c0_10] : memref<256x32xf32, #tpu.memory_space<vmem>>, vector<128x32xf32>
    %cst_11 = arith.constant dense<0.000000e+00> : vector<128x128xf32>
    %36 = tpu.matmul %35, %35, %cst_11 {dimension_numbers = #tpu.dot_dimension_numbers<[1], [1], [0], [0], [0, 0, 1, 0], [], []>} : vector<128x32xf32>, vector<128x32xf32>, vector<128x128xf32> -> vector<128x128xf32>
    %37 = arith.mulf %35, %35 : vector<128x32xf32>
    %cst_12 = arith.constant dense<0.000000e+00> : vector<128xf32>
    %38 = vector.multi_reduction <add>, %37, %cst_12 [1] : vector<128x32xf32> to vector<128xf32>
    %39 = vector.shape_cast %38 : vector<128xf32> to vector<128x1xf32>
    %40 = tpu.transpose %39, [1, 0] : vector<128x1xf32> -> vector<1x128xf32>
    %41 = vector.broadcast %39 : vector<128x1xf32> to vector<128x128xf32>
    %42 = vector.broadcast %40 : vector<1x128xf32> to vector<128x128xf32>
    %43 = arith.addf %41, %42 : vector<128x128xf32>
    %cst_13 = arith.constant 2.000000e+00 : f32
    %44 = vector.broadcast %cst_13 : f32 to vector<128x128xf32>
    %45 = arith.mulf %44, %36 : vector<128x128xf32>
    %46 = arith.subf %43, %45 : vector<128x128xf32>
    %cst_14 = arith.constant 0.000000e+00 : f32
    %47 = vector.broadcast %cst_14 : f32 to vector<128x128xf32>
    %48 = arith.maximumf %46, %47 : vector<128x128xf32>
    %cst_15 = arith.constant -1.562500e-01 : f32
    %49 = vector.broadcast %cst_15 : f32 to vector<128x128xf32>
    %50 = arith.mulf %48, %49 : vector<128x128xf32>
    %51 = math.exp %50 : vector<128x128xf32>
    %cst_16 = arith.constant dense<0.000000e+00> : vector<128x32xf32>
    %52 = tpu.matmul %51, %35, %cst_16 {dimension_numbers = #tpu.dot_dimension_numbers<[1], [0], [0], [1], [0, 0, 1, 1], [], []>} : vector<128x128xf32>, vector<128x32xf32>, vector<128x32xf32> -> vector<128x32xf32>
    %cst_17 = arith.constant 7.812500e-03 : f32
    %53 = vector.broadcast %cst_17 : f32 to vector<128x32xf32>
    %54 = arith.mulf %52, %53 : vector<128x32xf32>
    %c3_i32_18 = arith.constant 3 : i32
    %55 = arith.cmpi slt, %31, %c3_i32_18 : i32
    %cst_19 = arith.constant 0.000000e+00 : f32
    %56 = vector.broadcast %cst_19 : f32 to vector<128x32xf32>
    %57 = arith.select %55, %54, %56 : vector<128x32xf32>
    %58 = arith.index_cast %33 : i32 to index
    %c0_20 = arith.constant 0 : index
    %59 = vector.load %arg2[%58, %c0_20] : memref<256x32xf32, #tpu.memory_space<vmem>>, vector<128x32xf32>
    tpu.vector_store %arg2[%58, %c0_20], %57 {strides = array<i32>} : memref<256x32xf32, #tpu.memory_space<vmem>>, vector<128x32xf32>,
    %c2_i32_21 = arith.constant 2 : i32
    return
  }
  func.func @transform_0(%arg0: i32) -> (i32, i32) {
    %c0_i32 = arith.constant 0 : i32
    %c0_i32_0 = arith.constant 0 : i32
    return %arg0, %c0_i32 : i32, i32
  }
  func.func @transform_1(%arg0: i32) -> (i32, i32) {
    %c0_i32 = arith.constant 0 : i32
    %c0_i32_0 = arith.constant 0 : i32
    return %arg0, %c0_i32 : i32, i32
  }
}

</mosaic_0001>

<bundles_post_ra>
// kernel: tpu_custom_call.1
= control target key start
LH: loop header
LB: loop body
LE: loop exit
PB: predicated region body
PF: predicated region fallthrough
CT: control target
= control target key end

     0   :  { %s2445_s6 = smov 0   ;;  %s2447_s7 = smov 0   ;;  %s3385_s0 = inlined_call_operand.vmem [shape: f32[400,32], index: 0, kind: input, shape index: {}]   ;;  %s3386_s1 = inlined_call_operand.vmem [shape: f32[400,32], index: 1, kind: output, shape index: {}]  }
   0x1   :  { %s2449_s8 = smov 0  }
   0x2 LB: > { %s2458_s9 = sadd.s32 4294967295, %s2401_s8   ;;  %s2460_s10 = sadd.s32 1, %s2401_s8   ;;  %s2401_s8 = sphi %s2449_s8, %s3435_s8   ;;  %s2397_s7 = sphi %s2447_s7, %s3434_s7   ;;  %s2393_s6 = sphi %s2445_s6, %s3433_s6  }
   0x3   : > { %s41_s11 = ssub.s32 %s2401_s8, %s2460_s10  ;;  %s44_s12 = sadd.s32 1, %s2397_s7 }
   0x4   : > { %p42_p0 = scmp.eq.s32.totalorder %s41_s11, 0  ;;  %p54_p1 = scmp.ne.s32.totalorder %s2397_s7, %s2393_s6 }
   0x5   : > { %p55_p2 = scmp.eq.s32.totalorder %s2458_s9, 1  ;;  %p1722_p3 = scmp.ge.s32.totalorder %s2401_s8, 1 }
   0x6   : > { %s2468_s13 = scalar_select %p42_p0, %s2397_s7, %s44_s12  }
   0x7   : > { %p2470_p4 = por %p55_p2, %p54_p1  ;;  %p96_p5 = scmp.lt.s32.totalorder %s2401_s8, 3 }
   0x9   : > { %p97_p6 = pnand %p1722_p3, %p96_p5 }
   0xb   : > { %100 = sbr.rel (%p97_p6) target bundleno = 877 (0x36d), region = 24 }
  0x10   : > { %s2475_s15 = sshll.u32 %s2458_s9, 5  ;;  %vm155_vm0 = vcmask 261120   ;;  %s1726_s21 = sshll.u32 %s2458_s9, 1 }
  0x11   : > { %p124_p7 = scmp.lt.s32.totalorder %s2475_s15, 49  ;;  %p722_p8 = scmp.lt.s32.totalorder %s1726_s21, 3 }
  0x12   : > { %s116_s23 = sand.u32 1, %s2393_s6   ;;  %s758_s26 = sadd.s32 1, %s1726_s21 }
  0x13   : > { %s125_s16 = scalar_select %p124_p7, %s2475_s15, 49 }
  0x14   : > { %s723_s22 = scalar_select %p722_p8, 1, 0 }
  0x15   : > { %s1725_s17 = sshll.u32 %s125_s16, 3  ;;  %s1723_s24 = sshll.u32 %s116_s23, 8 }
  0x16   : > { %s2482_s20 = scalar_lea.vmem %s3385_s0, %s1725_s17  ;;  %s3076_s25 = scalar_lea.vmem [#allocation2], %s1723_s24  }
  0x17   : > { %v2485_v0 = vld [vmem:[%s2482_s20 + $0x78] sm:$0xff]  ;;  %v2488_v1 = vld [vmem:[%s2482_s20] sm:$0xff]  ;;  %v2491_v2 = vld [vmem:[%s2482_s20 + $0x70] sm:$0xff]  ;;  %p1342_p9 = scmp.lt.s32.totalorder %s758_s26, 3  ;;  %s1387_s28 = ssub.s32 (%p2470_p4), 50, %s2475_s15 }
  0x18   : > { %1971 = vmatprep.subr.msk.mxu0 %vm155_vm0, %v2485_v0  ;;  %v349_v3 = vmul.f32 %v2488_v1, %v2488_v1  ;;  %v2498_v4 = vld [vmem:[%s2482_s20 + $0x8] sm:$0xff]  ;;  %v2501_v5 = vld [vmem:[%s2482_s20 + $0x10] sm:$0xff]  ;;  %2003 = vmatprep.mubr.msk.f32.mxu0 %vm155_vm0, %v2488_v1  ;;  %v2512_v8 = vld [vmem:[%s2482_s20 + $0x18] sm:$0xff]  ;;  %v363_v43 = vmul.f32 %v2491_v2, %v2491_v2  ;;  %v364_v45 = vmul.f32 %v2485_v0, %v2485_v0  ;;  %s1840_s29 = sshll.u32 (%p2470_p4), %s2458_s9, 8  ;;  %p1388_p10 = scmp.lt.s32.totalorder (%p2470_p4), %s1387_s28, 32 }
  0x19   : > { %1972 = vmatpush3.xpose.msk.msra.mxu0 %vm155_vm0, %v2485_v0  ;;  %v350_v6 = vmul.f32 %v2498_v4, %v2498_v4  ;;  %v351_v7 = vmul.f32 %v2501_v5, %v2501_v5  ;;  %2027 = vmatprep.subr.mxu1 %v2485_v0  ;;  %v352_v10 = vmul.f32 %v2512_v8, %v2512_v8  ;;  %v2521_v11 = vld [vmem:[%s2482_s20 + $0x20] sm:$0xff]  ;;  %v2524_v12 = vld [vmem:[%s2482_s20 + $0x28] sm:$0xff]  ;;  %v2542_v19 = vld [vmem:[%s2482_s20 + $0x30] sm:$0xff]  ;;  %s1343_s27 = scalar_select %p1342_p9, 1, 0 }
  0x1a   : > { %v365_v9 = vsel %vm155_vm0, %v349_v3, 0.0  ;;  %1973 = vmatprep.subr.msk.mxu0 %vm155_vm0, %v2491_v2  ;;  %2028 = vmatpush3.msra.mxu1 %v2485_v0  ;;  %v2528_v13 = vld [vmem:[%s2482_s20 + $0x68] sm:$0xff]  ;;  %v353_v16 = vmul.f32 %v2521_v11, %v2521_v11  ;;  %v354_v18 = vmul.f32 %v2524_v12, %v2524_v12  ;;  %v2548_v20 = vld [vmem:[%s2482_s20 + $0x60] sm:$0xff]  ;;  %v2551_v21 = vld [vmem:[%s2482_s20 + $0x38] sm:$0xff]  ;;  %v355_v24 = vmul.f32 %v2542_v19, %v2542_v19  ;;  %s3253_s3 = scalar_lea.vmem (%p2470_p4), %s3386_s1, %s1840_s29  }
  0x1b   : > { %366 = vadd.xlane.f32.xlu0 %v365_v9  ;;  %v371_v14 = vsel %vm155_vm0, %v351_v7, 0.0  ;;  %2029 = vmatprep.subr.mxu1 %v2491_v2  ;;  %v368_v15 = vsel %vm155_vm0, %v350_v6, 0.0  ;;  %v374_v17 = vsel %vm155_vm0, %v352_v10, 0.0  ;;  %v2556_v22 = vld [vmem:[%s2482_s20 + $0x58] sm:$0xff]  ;;  %v356_v26 = vmul.f32 %v2551_v21, %v2551_v21  ;;  %v2571_v27 = vld [vmem:[%s2482_s20 + $0x50] sm:$0xff]  ;;  %v2575_v28 = vld [vmem:[%s2482_s20 + $0x40] sm:$0xff] }
  0x1c   : > { %372 = vadd.xlane.f32.xlu1 %v371_v14  ;;  %2030 = vmatpush3.msra.mxu1 %v2491_v2  ;;  %v377_v23 = vsel %vm155_vm0, %v353_v16, 0.0  ;;  %v380_v25 = vsel %vm155_vm0, %v354_v18, 0.0  ;;  %v2579_v29 = vld [vmem:[%s2482_s20 + $0x48] sm:$0xff]  ;;  %v383_v30 = vsel %vm155_vm0, %v355_v24, 0.0  ;;  %v357_v31 = vmul.f32 %v2575_v28, %v2575_v28  ;;  %v2637_v46 = vld [vmem:[%s2482_s20 + $0x80] sm:$0xff]  ;;  %v2664_v53 = vld [vmem:[%s2482_s20 + $0x90] sm:$0xff] }
  0x1d   : > { %1974 = vmatpush3.xpose.msk.msra.mxu0 %vm155_vm0, %v2491_v2  ;;  %2031 = vmatprep.subr.mxu1 %v2528_v13  ;;  %v386_v32 = vsel %vm155_vm0, %v356_v26, 0.0  ;;  %v358_v33 = vmul.f32 %v2579_v29, %v2579_v29  ;;  %v359_v35 = vmul.f32 %v2571_v27, %v2571_v27  ;;  %v360_v37 = vmul.f32 %v2556_v22, %v2556_v22  ;;  %v2652_v50 = vld [vmem:[%s2482_s20 + $0x88] sm:$0xff]  ;;  %v2674_v56 = vld [vmem:[%s2482_s20 + $0x98] sm:$0xff]  ;;  %v2684_v59 = vld [vmem:[%s2482_s20 + $0xa0] sm:$0xff] }
  0x1e   : > { %1975 = vmatprep.subr.msk.mxu0 %vm155_vm0, %v2528_v13  ;;  %2032 = vmatpush3.msra.mxu1 %v2528_v13  ;;  %v389_v34 = vsel %vm155_vm0, %v357_v31, 0.0  ;;  %v361_v39 = vmul.f32 %v2548_v20, %v2548_v20  ;;  %v362_v41 = vmul.f32 %v2528_v13, %v2528_v13  ;;  %v407_v47 = vsel %vm155_vm0, %v363_v43, 0.0  ;;  %v2694_v62 = vld [vmem:[%s2482_s20 + $0xa8] sm:$0xff]  ;;  %v2704_v6 = vld [vmem:[%s2482_s20 + $0xb0] sm:$0xff]  ;;  %v2714_v10 = vld [vmem:[%s2482_s20 + $0xb8] sm:$0xff] }
  0x1f   : > { %369 = vadd.xlane.f32.xlu0 %v368_v15  ;;  %2033 = vmatprep.subr.mxu1 %v2548_v20  ;;  %v392_v36 = vsel %vm155_vm0, %v358_v33, 0.0  ;;  %v395_v38 = vsel %vm155_vm0, %v359_v35, 0.0  ;;  %v398_v40 = vsel %vm155_vm0, %v360_v37, 0.0  ;;  %v410_v48 = vsel %vm155_vm0, %v364_v45, 0.0  ;;  %v2724_v16 = vld [vmem:[%s2482_s20 + $0xc0] sm:$0xff]  ;;  %v2752_v26 = vld [vmem:[%s2482_s20 + $0xd8] sm:$0xff] }
  0x20   : > { %375 = vadd.xlane.f32.xlu1 %v374_v17  ;;  %2034 = vmatpush3.msra.mxu1 %v2548_v20  ;;  %v401_v42 = vsel %vm155_vm0, %v361_v39, 0.0  ;;  %v404_v44 = vsel %vm155_vm0, %v362_v41, 0.0  ;;  %v969_v49 = vmul.f32 %v2637_v46, %v2637_v46  ;;  %v970_v52 = vmul.f32 %v2652_v50, %v2652_v50  ;;  %v2765_v31 = vld [vmem:[%s2482_s20 + $0xf8] sm:$0xff]  ;;  %v2782_v33 = vld [vmem:[%s2482_s20 + $0xe8] sm:$0xff] }
  0x21   : > { %1976 = vmatpush3.xpose.msk.msra.mxu0 %vm155_vm0, %v2528_v13  ;;  %2035 = vmatprep.subr.mxu1 %v2556_v22  ;;  %v971_v55 = vmul.f32 %v2664_v53, %v2664_v53  ;;  %v972_v58 = vmul.f32 %v2674_v56, %v2674_v56  ;;  %v973_v61 = vmul.f32 %v2684_v59, %v2684_v59 }
  0x22   : > { %1977 = vmatprep.subr.msk.mxu0 %vm155_vm0, %v2548_v20  ;;  %2036 = vmatpush3.msra.mxu1 %v2556_v22  ;;  %v985_v51 = vsel %vm155_vm0, %v969_v49, 0.0  ;;  %v988_v54 = vsel %vm155_vm0, %v970_v52, 0.0  ;;  %v974_v3 = vmul.f32 %v2694_v62, %v2694_v62  ;;  %v975_v9 = vmul.f32 %v2704_v6, %v2704_v6 }
  0x23   : > { %378 = vadd.xlane.f32.xlu0 %v377_v23  ;;  %2037 = vmatprep.subr.mxu1 %v2571_v27  ;;  %v991_v57 = vsel %vm155_vm0, %v971_v55, 0.0  ;;  %v994_v60 = vsel %vm155_vm0, %v972_v58, 0.0  ;;  %v997_v63 = vsel %vm155_vm0, %v973_v61, 0.0  ;;  %v976_v15 = vmul.f32 %v2714_v10, %v2714_v10  ;;  %v2732_v23 = vld [vmem:[%s2482_s20 + $0xc8] sm:$0xff] }
  0x24   : > { %381 = vadd.xlane.f32.xlu1 %v380_v25  ;;  %2038 = vmatpush3.msra.mxu1 %v2571_v27  ;;  %v1000_v7 = vsel %vm155_vm0, %v974_v3, 0.0  ;;  %v1003_v14 = vsel %vm155_vm0, %v975_v9, 0.0  ;;  %v977_v18 = vmul.f32 %v2724_v16, %v2724_v16  ;;  %v2742_v25 = vld [vmem:[%s2482_s20 + $0xd0] sm:$0xff] }
  0x25   : > { %1978 = vmatpush3.xpose.msk.msra.mxu0 %vm155_vm0, %v2548_v20  ;;  %2039 = vmatprep.subr.mxu1 %v2579_v29  ;;  %v1006_v17 = vsel %vm155_vm0, %v976_v15, 0.0 }
  0x26   : > { %1979 = vmatprep.subr.msk.mxu0 %vm155_vm0, %v2556_v22  ;;  %2040 = vmatpush3.msra.mxu1 %v2579_v29  ;;  %v1009_v24 = vsel %vm155_vm0, %v977_v18, 0.0  ;;  %v445_v18 = vlaneseq }
  0x27   : > { %384 = vadd.xlane.f32.xlu0 %v383_v30  ;;  %2041 = vmatprep.subr.mxu1 %v2575_v28  ;;  %v2762_v30 = vld [vmem:[%s2482_s20 + $0xe0] sm:$0xff] }
  0x28   : > { %387 = vadd.xlane.f32.xlu1 %v386_v32  ;;  %2042 = vmatpush3.msra.mxu1 %v2575_v28  ;;  %v2778_v32 = vld [vmem:[%s2482_s20 + $0xf0] sm:$0xff] }
  0x29   : > { %1980 = vmatpush3.xpose.msk.msra.mxu0 %vm155_vm0, %v2556_v22  ;;  %2043 = vmatprep.subr.mxu1 %v2551_v21 }
  0x2a   : > { %1981 = vmatprep.subr.msk.mxu0 %vm155_vm0, %v2571_v27  ;;  %2044 = vmatpush3.msra.mxu1 %v2551_v21 }
  0x2b   : > { %390 = vadd.xlane.f32.xlu0 %v389_v34  ;;  %2045 = vmatprep.subr.mxu1 %v2542_v19 }
  0x2c   : > { %393 = vadd.xlane.f32.xlu1 %v392_v36  ;;  %2046 = vmatpush3.msra.mxu1 %v2542_v19 }
  0x2d   : > { %1982 = vmatpush3.xpose.msk.msra.mxu0 %vm155_vm0, %v2571_v27  ;;  %2047 = vmatprep.subr.mxu1 %v2524_v12 }
  0x2e   : > { %1983 = vmatprep.subr.msk.mxu0 %vm155_vm0, %v2579_v29  ;;  %2048 = vmatpush3.msra.mxu1 %v2524_v12 }
  0x2f   : > { %396 = vadd.xlane.f32.xlu0 %v395_v38  ;;  %2049 = vmatprep.subr.mxu1 %v2521_v11 }
  0x30   : > { %399 = vadd.xlane.f32.xlu1 %v398_v40  ;;  %2050 = vmatpush3.msra.mxu1 %v2521_v11 }
  0x31   : > { %1984 = vmatpush3.xpose.msk.msra.mxu0 %vm155_vm0, %v2579_v29  ;;  %2051 = vmatprep.subr.mxu1 %v2512_v8 }
  0x32   : > { %1985 = vmatprep.subr.msk.mxu0 %vm155_vm0, %v2575_v28  ;;  %2052 = vmatpush3.msra.mxu1 %v2512_v8 }
  0x33   : > { %402 = vadd.xlane.f32.xlu0 %v401_v42  ;;  %2053 = vmatprep.subr.mxu1 %v2501_v5 }
  0x34   : > { %405 = vadd.xlane.f32.xlu1 %v404_v44  ;;  %2054 = vmatpush3.msra.mxu1 %v2501_v5 }
  0x35   : > { %1986 = vmatpush3.xpose.msk.msra.mxu0 %vm155_vm0, %v2575_v28  ;;  %2055 = vmatprep.subr.mxu1 %v2498_v4 }
  0x36   : > { %1987 = vmatprep.subr.msk.mxu0 %vm155_vm0, %v2551_v21  ;;  %2056 = vmatpush3.msra.mxu1 %v2498_v4 }
  0x37   : > { %408 = vadd.xlane.f32.xlu0 %v407_v47  ;;  %2057 = vmatprep.subr.mxu1 %v2488_v1 }
  0x38   : > { %411 = vadd.xlane.f32.xlu1 %v410_v48  ;;  %2058 = vmatpush3.msra.mxu1 %v2488_v1 }
  0x39   : > { %1988 = vmatpush3.xpose.msk.msra.mxu0 %vm155_vm0, %v2551_v21  ;;  %2083 = vmatprep.subr.msk.mxu1 %vm155_vm0, %v2765_v31 }
  0x3a   : > { %1989 = vmatprep.subr.msk.mxu0 %vm155_vm0, %v2542_v19 }
  0x3c   : > { %986 = vadd.xlane.f32.xlu1 %v985_v51 }
  0x3d   : > { %1990 = vmatpush3.xpose.msk.msra.mxu0 %vm155_vm0, %v2542_v19 }
  0x3e   : > { %1991 = vmatprep.subr.msk.mxu0 %vm155_vm0, %v2524_v12 }
  0x40   : > { %989 = vadd.xlane.f32.xlu1 %v988_v54 }
  0x41   : > { %1992 = vmatpush3.xpose.msk.msra.mxu0 %vm155_vm0, %v2524_v12 }
  0x42   : > { %1993 = vmatprep.subr.msk.mxu0 %vm155_vm0, %v2521_v11 }
  0x44   : > { %992 = vadd.xlane.f32.xlu1 %v991_v57 }
  0x45   : > { %1994 = vmatpush3.xpose.msk.msra.mxu0 %vm155_vm0, %v2521_v11 }
  0x46   : > { %1995 = vmatprep.subr.msk.mxu0 %vm155_vm0, %v2512_v8 }
  0x48   : > { %995 = vadd.xlane.f32.xlu1 %v994_v60 }
  0x49   : > { %1996 = vmatpush3.xpose.msk.msra.mxu0 %vm155_vm0, %v2512_v8 }
  0x4a   : > { %1997 = vmatprep.subr.msk.mxu0 %vm155_vm0, %v2501_v5 }
  0x4c   : > { %998 = vadd.xlane.f32.xlu1 %v997_v63 }
  0x4d   : > { %1998 = vmatpush3.xpose.msk.msra.mxu0 %vm155_vm0, %v2501_v5 }
  0x4e   : > { %1999 = vmatprep.subr.msk.mxu0 %vm155_vm0, %v2498_v4 }
  0x50   : > { %1001 = vadd.xlane.f32.xlu1 %v1000_v7 }
  0x51   : > { %2000 = vmatpush3.xpose.msk.msra.mxu0 %vm155_vm0, %v2498_v4 }
  0x52   : > { %2001 = vmatprep.subr.msk.mxu0 %vm155_vm0, %v2488_v1 }
  0x54   : > { %1004 = vadd.xlane.f32.xlu1 %v1003_v14 }
  0x55   : > { %2002 = vmatpush3.xpose.msk.msra.mxu0 %vm155_vm0, %v2488_v1  ;;  %v978_v1 = vmul.f32 %v2732_v23, %v2732_v23 }
  0x56   : > { %2139 = vmatprep.subr.mxu0 %v2765_v31 }
  0x58   : > { %2004 = vmatmul.mubr.msk.f32.vlgmr.msra.gmra.mxu0 %vm155_vm0, %v2498_v4  ;;  %1007 = vadd.xlane.f32.xlu1 %v1006_v17  ;;  %v1012_v4 = vsel %vm155_vm0, %v978_v1, 0.0 }
  0x59   : > { %2006 = vmatprep.mubr.msk.f32.mxu0 %vm155_vm0, %v2501_v5  ;;  %v979_v5 = vmul.f32 %v2742_v25, %v2742_v25  ;;  %2140 = vmatpush3.msra.mxu0 %v2765_v31 }
  0x5a   : > { %2141 = vmatprep.subr.mxu0 %v2778_v32 }
  0x5b   : > { %2142 = vmatpush3.msra.mxu0 %v2778_v32 }
  0x5c   : > { %2007 = vmatmul.mubr.msk.f32.gmra.mxu0 %vm155_vm0, %v2512_v8  ;;  %1010 = vadd.xlane.f32.xlu1 %v1009_v24  ;;  %v1015_v8 = vsel %vm155_vm0, %v979_v5, 0.0 }
  0x5d   : > { %2009 = vmatprep.mubr.msk.f32.mxu0 %vm155_vm0, %v2521_v11  ;;  %v980_v11 = vmul.f32 %v2752_v26, %v2752_v26  ;;  %2143 = vmatprep.subr.mxu0 %v2782_v33 }
  0x5e   : > { %2144 = vmatpush3.msra.mxu0 %v2782_v33 }
  0x5f   : > { %2145 = vmatprep.subr.mxu0 %v2762_v30 }
  0x60   : > { %2010 = vmatmul.mubr.msk.f32.gmra.mxu0 %vm155_vm0, %v2524_v12  ;;  %1013 = vadd.xlane.f32.xlu1 %v1012_v4  ;;  %v1018_v12 = vsel %vm155_vm0, %v980_v11, 0.0  ;;  %v2934_v4 = vshrl.u32 %v445_v18, 7 }
  0x61   : > { %2012 = vmatprep.mubr.msk.f32.mxu0 %vm155_vm0, %v2542_v19  ;;  %v981_v19 = vmul.f32 %v2762_v30, %v2762_v30  ;;  %2146 = vmatpush3.msra.mxu0 %v2762_v30 }
  0x62   : > { %2147 = vmatprep.subr.mxu0 %v2752_v26  ;;  %v3391_v11 = vsub.s32 0, %v2934_v4 }
  0x63   : > { %2148 = vmatpush3.msra.mxu0 %v2752_v26 }
  0x64   : > { %2013 = vmatmul.mubr.msk.f32.gmra.mxu0 %vm155_vm0, %v2551_v21  ;;  %1016 = vadd.xlane.f32.xlu1 %v1015_v8  ;;  %v1021_v21 = vsel %vm155_vm0, %v981_v19, 0.0 }
  0x65   : > { %2015 = vmatprep.mubr.msk.f32.mxu0 %vm155_vm0, %v2575_v28  ;;  %v982_v28 = vmul.f32 %v2782_v33, %v2782_v33  ;;  %2149 = vmatprep.subr.mxu0 %v2742_v25 }
  0x66   : > { %2150 = vmatpush3.msra.mxu0 %v2742_v25 }
  0x67   : > { %2151 = vmatprep.subr.mxu0 %v2732_v23 }
  0x68   : > { %2016 = vmatmul.mubr.msk.f32.gmra.mxu0 %vm155_vm0, %v2579_v29  ;;  %1019 = vadd.xlane.f32.xlu1 %v1018_v12  ;;  %v983_v29 = vmul.f32 %v2778_v32, %v2778_v32 }
  0x69   : > { %2018 = vmatprep.mubr.msk.f32.mxu0 %vm155_vm0, %v2571_v27  ;;  %v1024_v27 = vsel %vm155_vm0, %v982_v28, 0.0  ;;  %2152 = vmatpush3.msra.mxu0 %v2732_v23 }
  0x6a   : > { %2153 = vmatprep.subr.mxu0 %v2724_v16 }
  0x6b   : > { %2154 = vmatpush3.msra.mxu0 %v2724_v16 }
  0x6c   : > { %2019 = vmatmul.mubr.msk.f32.gmra.mxu0 %vm155_vm0, %v2556_v22  ;;  %1022 = vadd.xlane.f32.xlu1 %v1021_v21  ;;  %v984_v22 = vmul.f32 %v2765_v31, %v2765_v31 }
  0x6d   : > { %2021 = vmatprep.mubr.msk.f32.mxu0 %vm155_vm0, %v2548_v20  ;;  %v1027_v20 = vsel %vm155_vm0, %v983_v29, 0.0  ;;  %2155 = vmatprep.subr.mxu0 %v2714_v10 }
  0x6e   : > { %2156 = vmatpush3.msra.mxu0 %v2714_v10 }
  0x6f   : > { %2157 = vmatprep.subr.mxu0 %v2704_v6 }
  0x70   : > { %2022 = vmatmul.mubr.msk.f32.gmra.mxu0 %vm155_vm0, %v2528_v13  ;;  %1025 = vadd.xlane.f32.xlu1 %v1024_v27  ;;  %v1030_v13 = vsel %vm155_vm0, %v984_v22, 0.0 }
  0x71   : > { %2024 = vmatprep.mubr.msk.f32.mxu0 %vm155_vm0, %v2491_v2  ;;  %2158 = vmatpush3.msra.mxu0 %v2704_v6 }
  0x72   : > { %2159 = vmatprep.subr.mxu0 %v2694_v62 }
  0x73   : > { %2160 = vmatpush3.msra.mxu0 %v2694_v62 }
  0x74   : > { %2025 = vmatmul.mubr.msk.f32.gmra.mxu0 %vm155_vm0, %v2485_v0  ;;  %1028 = vadd.xlane.f32.xlu1 %v1027_v20 }
  0x75   : > { %2161 = vmatprep.subr.mxu0 %v2684_v59 }
  0x76   : > { %2162 = vmatpush3.msra.mxu0 %v2684_v59 }
  0x77   : > { %2163 = vmatprep.subr.mxu0 %v2674_v56 }
  0x78   : > { %1031 = vadd.xlane.f32.xlu1 %v1030_v13  ;;  %2164 = vmatpush3.msra.mxu0 %v2674_v56 }
  0x79   : > { %2165 = vmatprep.subr.mxu0 %v2664_v53 }
  0x7a   : > { %2166 = vmatpush3.msra.mxu0 %v2664_v53 }
  0x7b   : > { %2167 = vmatprep.subr.mxu0 %v2652_v50 }
  0x7c   : > { %2168 = vmatpush3.msra.mxu0 %v2652_v50 }
  0x7d   : > { %2169 = vmatprep.subr.mxu0 %v2637_v46 }
  0x7e   : > { %2170 = vmatpush3.msra.mxu0 %v2637_v46 }
  0xa4   : > { %v2838_v0 = vpop.xlane.xlu0 %366 }
  0xa5   : > { %413 = vxpose.xlu0.b32.start [1/16] (narrow) %v2838_v0, 8  ;;  %v2841_v2 = vpop.xlane.xlu1 %372 }
  0xa8   : > { %v2843_v34 = vpop.xlane.xlu0 %369 }
  0xa9   : > { %414 = vxpose.xlu0.b32.cont [2/16] (narrow) %v2843_v34, 8  ;;  %v2846_v35 = vpop.xlane.xlu1 %375 }
  0xac   : > { %v2854_v38 = vpop.xlane.xlu0 %378 }
  0xad   : > { %415 = vxpose.xlu0.b32.cont [3/16] (narrow) %v2841_v2, 8  ;;  %v2849_v36 = vpop.xlane.xlu1 %381 }
  0xb0   : > { %v2862_v41 = vpop.xlane.xlu0 %384 }
  0xb1   : > { %416 = vxpose.xlu0.b32.cont [4/16] (narrow) %v2846_v35, 8  ;;  %v2852_v37 = vpop.xlane.xlu1 %387 }
  0xb4   : > { %v2870_v44 = vpop.xlane.xlu0 %390 }
  0xb5   : > { %417 = vxpose.xlu0.b32.cont [5/16] (narrow) %v2854_v38, 8  ;;  %v2857_v39 = vpop.xlane.xlu1 %393 }
  0xb8   : > { %v2877_v47 = vpop.xlane.xlu0 %396 }
  0xb9   : > { %418 = vxpose.xlu0.b32.cont [6/16] (narrow) %v2849_v36, 8  ;;  %v2860_v40 = vpop.xlane.xlu1 %399 }
  0xbc   : > { %v2886_v51 = vpop.xlane.xlu0 %402 }
  0xbd   : > { %419 = vxpose.xlu0.b32.cont [7/16] (narrow) %v2862_v41, 8  ;;  %v2865_v42 = vpop.xlane.xlu1 %405 }
  0xc0   : > { %v2896_v55 = vpop.xlane.xlu0 %408 }
  0xc1   : > { %420 = vxpose.xlu0.b32.cont [8/16] (narrow) %v2852_v37, 8  ;;  %v2868_v43 = vpop.xlane.xlu1 %411 }
  0xc5   : > { %421 = vxpose.xlu0.b32.cont [9/16] (narrow) %v2870_v44, 8  ;;  %v2873_v45 = vpop.xlane.xlu1 %986 }
  0xc6   : > { %1033 = vxpose.xlu1.b32.start [1/16] (narrow) %v2873_v45, 8 }
  0xc9   : > { %422 = vxpose.xlu0.b32.cont [10/16] (narrow) %v2857_v39, 8  ;;  %v2879_v48 = vpop.xlane.xlu1 %989 }
  0xca   : > { %1034 = vxpose.xlu1.b32.cont [2/16] (narrow) %v2879_v48, 8 }
  0xcd   : > { %423 = vxpose.xlu0.b32.cont [11/16] (narrow) %v2877_v47, 8  ;;  %v2884_v49 = vpop.xlane.xlu1 %992 }
  0xce   : > { %1035 = vxpose.xlu1.b32.cont [3/16] (narrow) %v2884_v49, 8 }
  0xd1   : > { %424 = vxpose.xlu0.b32.cont [12/16] (narrow) %v2860_v40, 8  ;;  %v2890_v52 = vpop.xlane.xlu1 %995 }
  0xd2   : > { %1036 = vxpose.xlu1.b32.cont [4/16] (narrow) %v2890_v52, 8 }
  0xd5   : > { %425 = vxpose.xlu0.b32.cont [13/16] (narrow) %v2886_v51, 8  ;;  %v2894_v54 = vpop.xlane.xlu1 %998 }
  0xd6   : > { %3401 = vst [vmem:[#allocation3_spill] sm:$0xff] %v2894_v54  ;;  %1037 = vxpose.xlu1.b32.cont [5/16] (narrow) %v2894_v54, 8 }
  0xd9   : > { %426 = vxpose.xlu0.b32.cont [14/16] (narrow) %v2865_v42, 8  ;;  %v2900_v57 = vpop.xlane.xlu1 %1001 }
  0xda   : > { %3402 = vst [vmem:[#allocation4_spill] sm:$0xff] %v2900_v57  ;;  %1038 = vxpose.xlu1.b32.cont [6/16] (narrow) %v2900_v57, 8 }
  0xdd   : > { %427 = vxpose.xlu0.b32.cont [15/16] (narrow) %v2896_v55, 8  ;;  %v2904_v58 = vpop.xlane.xlu1 %1004 }
  0xde   : > { %3403 = vst [vmem:[#allocation5_spill] sm:$0xff] %v2904_v58  ;;  %1039 = vxpose.xlu1.b32.cont [7/16] (narrow) %v2904_v58, 8 }
  0xe1   : > { %428 = vxpose.xlu0.b32.end [16/16] (narrow) %v2868_v43, 8  ;;  %v2907_v60 = vpop.xlane.xlu1 %1007 }
  0xe2   : > { %3404 = vst [vmem:[#allocation6_spill] sm:$0xff] %v2907_v60  ;;  %1040 = vxpose.xlu1.b32.cont [8/16] (narrow) %v2907_v60, 8 }
  0xe5   : > { %v2910_v61 = vpop.xlane.xlu1 %1010 }
  0xe6   : > { %3405 = vst [vmem:[#allocation7_spill] sm:$0xff] %v2910_v61  ;;  %1041 = vxpose.xlu1.b32.cont [9/16] (narrow) %v2910_v61, 8 }
  0xe9   : > { %v2913_v63 = vpop.xlane.xlu1 %1013 }
  0xea   : > { %3406 = vst [vmem:[#allocation8_spill] sm:$0xff] %v2913_v63  ;;  %1042 = vxpose.xlu1.b32.cont [10/16] (narrow) %v2913_v63, 8 }
  0xed   : > { %v2916_v3 = vpop.xlane.xlu1 %1016 }
  0xee   : > { %3407 = vst [vmem:[#allocation9_spill] sm:$0xff] %v2916_v3  ;;  %1043 = vxpose.xlu1.b32.cont [11/16] (narrow) %v2916_v3, 8 }
  0xf1   : > { %v2919_v7 = vpop.xlane.xlu1 %1019 }
  0xf2   : > { %3408 = vst [vmem:[#allocation10_spill] sm:$0xff] %v2919_v7  ;;  %1044 = vxpose.xlu1.b32.cont [12/16] (narrow) %v2919_v7, 8 }
  0xf5   : > { %v2922_v9 = vpop.xlane.xlu1 %1022 }
  0xf6   : > { %3409 = vst [vmem:[#allocation11_spill] sm:$0xff] %v2922_v9  ;;  %1045 = vxpose.xlu1.b32.cont [13/16] (narrow) %v2922_v9, 8 }
  0xf9   : > { %v2925_v14 = vpop.xlane.xlu1 %1025 }
  0xfa   : > { %3410 = vst [vmem:[#allocation12_spill] sm:$0xff] %v2925_v14  ;;  %1046 = vxpose.xlu1.b32.cont [14/16] (narrow) %v2925_v14, 8 }
  0xfd   : > { %v2928_v15 = vpop.xlane.xlu1 %1028 }
  0xfe   : > { %3411 = vst [vmem:[#allocation13_spill] sm:$0xff] %v2928_v15  ;;  %1047 = vxpose.xlu1.b32.cont [15/16] (narrow) %v2928_v15, 8 }
 0x101   : > { %v2931_v17 = vpop.xlane.xlu1 %1031 }
 0x102   : > { %3412 = vst [vmem:[#allocation14_spill] sm:$0xff] %v2931_v17  ;;  %1048 = vxpose.xlu1.b32.end [16/16] (narrow) %v2931_v17, 8 }
 0x118   : > { %v2005_v24 = vpop.f32.mrf.mxu0 }
 0x119   : > { %v466_v18 = vmul.f32 2.0, %v2005_v24 }
 0x11a   : > { %v270_v1 = vpop.f32.mrf.mxu0 }
 0x11b   : > { %v465_v22 = vmul.f32 2.0, %v270_v1 }
 0x11c   : > { %v2008_v5 = vpop.f32.mrf.mxu0 }
 0x11e   : > { %v280_v8 = vpop.f32.mrf.mxu0 }
 0x11f   : > { %v467_v29 = vmul.f32 2.0, %v280_v8 }
 0x120   : > { %v2011_v12 = vpop.f32.mrf.mxu0 }
 0x121   : > { %v429_v19 = vpop.trf.xlu0 }
 0x122   : > { %v290_v21 = vpop.f32.mrf.mxu0  ;;  %v2939_v28 = vrot.slane %v429_v19, %v3391_v11 }
 0x123   : > { %v469_v19 = vmul.f32 2.0, %v290_v21 }
 0x124   : > { %v2014_v27 = vpop.f32.mrf.mxu0  ;;  %v449_v13 = vadd.f32 %v2939_v28, %v2838_v0  ;;  %v450_v17 = vadd.f32 %v2939_v28, %v2843_v34  ;;  %v451_v9 = vadd.f32 %v2939_v28, %v2841_v2  ;;  %v453_v14 = vadd.f32 %v2939_v28, %v2854_v38 }
 0x125   : > { %v468_v0 = vmul.f32 2.0, %v2008_v5  ;;  %v452_v2 = vadd.f32 %v2939_v28, %v2846_v35  ;;  %v455_v38 = vadd.f32 %v2939_v28, %v2862_v41  ;;  %v472_v5 = vmul.f32 2.0, %v2014_v27 }
 0x126   : > { %v300_v20 = vpop.f32.mrf.mxu0  ;;  %v481_v11 = vsub.f32 %v449_v13, %v465_v22  ;;  %v482_v8 = vsub.f32 %v450_v17, %v466_v18  ;;  %v483_v7 = vsub.f32 %v451_v9, %v467_v29  ;;  %v485_v24 = vsub.f32 %v453_v14, %v469_v19 }
 0x127   : > { %v471_v58 = vmul.f32 2.0, %v300_v20  ;;  %v470_v19 = vmul.f32 2.0, %v2011_v12 }
 0x128   : > { %v2017_v15 = vpop.f32.mrf.mxu0  ;;  %v497_v61 = vmax.f32 %v481_v11, 0.0  ;;  %v498_v63 = vmax.f32 %v482_v8, 0.0  ;;  %v499_v57 = vmax.f32 %v483_v7, 0.0  ;;  %v501_v9 = vmax.f32 %v485_v24, 0.0 }
 0x129   : > { %v456_v11 = vadd.f32 %v2939_v28, %v2852_v37  ;;  %v487_v14 = vsub.f32 %v455_v38, %v471_v58  ;;  %v457_v7 = vadd.f32 %v2939_v28, %v2870_v44  ;;  %v474_v18 = vmul.f32 2.0, %v2017_v15 }
 0x12a   : > { %v310_v3 = vpop.f32.mrf.mxu0  ;;  %v513_v54 = vmul.f32 -0.15625, %v497_v61  ;;  %v514_v34 = vmul.f32 -0.15625, %v498_v63  ;;  %v515_v29 = vmul.f32 -0.15625, %v499_v57  ;;  %v484_v61 = vsub.f32 %v452_v2, %v468_v0 }
 0x12b   : > { %v473_v63 = vmul.f32 2.0, %v310_v3  ;;  %v517_v41 = vmul.f32 -0.15625, %v501_v9  ;;  %v488_v13 = vsub.f32 %v456_v11, %v472_v5  ;;  %v458_v37 = vadd.f32 %v2939_v28, %v2857_v39 }
 0x12c   : > { %v2020_v1 = vpop.f32.mrf.mxu0  ;;  %v529_v22 = vmul.f32 1.442695, %v513_v54  ;;  %v531_v17 = vmul.f32 1.442695, %v514_v34  ;;  %v533_v20 = vmul.f32 1.442695, %v515_v29  ;;  %v459_v3 = vadd.f32 %v2939_v28, %v2877_v47 }
 0x12d   : > { %v503_v54 = vmax.f32 %v487_v14, 0.0  ;;  %v500_v8 = vmax.f32 %v484_v61, 0.0  ;;  %v489_v58 = vsub.f32 %v457_v7, %v473_v63  ;;  %v454_v0 = vadd.f32 %v2939_v28, %v2849_v36 }
 0x12e   : > { %v320_v60 = vpop.f32.mrf.mxu0  ;;  %2283 = vpow2.f32 %v529_v22  ;;  %v537_v24 = vmul.f32 1.442695, %v517_v41  ;;  %v504_v34 = vmax.f32 %v488_v13, 0.0  ;;  %v490_v15 = vsub.f32 %v458_v37, %v474_v18 }
 0x12f   : > { %2285 = vpow2.f32 %v531_v17  ;;  %v475_v57 = vmul.f32 2.0, %v320_v60  ;;  %v516_v44 = vmul.f32 -0.15625, %v500_v8  ;;  %v519_v2 = vmul.f32 -0.15625, %v503_v54 }
 0x130   : > { %v2023_v21 = vpop.f32.mrf.mxu0  ;;  %2287 = vpow2.f32 %v533_v20  ;;  %v476_v12 = vmul.f32 2.0, %v2020_v1  ;;  %v486_v22 = vsub.f32 %v454_v0, %v470_v19  ;;  %v505_v17 = vmax.f32 %v489_v58, 0.0 }
 0x131   : > { %v535_v38 = vmul.f32 1.442695, %v516_v44  ;;  %v491_v9 = vsub.f32 %v459_v3, %v475_v57  ;;  %v460_v60 = vadd.f32 %v2939_v28, %v2860_v40  ;;  %v461_v47 = vadd.f32 %v2939_v28, %v2886_v51 }
 0x132   : > { %v330_v35 = vpop.f32.mrf.mxu0  ;;  %v502_v5 = vmax.f32 %v486_v22, 0.0  ;;  %v520_v36 = vmul.f32 -0.15625, %v504_v34  ;;  %v541_v14 = vmul.f32 1.442695, %v519_v2  ;;  %v506_v29 = vmax.f32 %v490_v15, 0.0 }
 0x133   : > { %v477_v39 = vmul.f32 2.0, %v330_v35  ;;  %2289 = vpow2.f32 %v535_v38  ;;  %v492_v61 = vsub.f32 %v460_v60, %v476_v12  ;;  %v478_v1 = vmul.f32 2.0, %v2023_v21 }
 0x134   : > { %v2026_v27 = vpop.f32.mrf.mxu0  ;;  %2291 = vpow2.f32 %v537_v24  ;;  %v518_v63 = vmul.f32 -0.15625, %v502_v5  ;;  %v521_v20 = vmul.f32 -0.15625, %v505_v17  ;;  %v507_v41 = vmax.f32 %v491_v9, 0.0 }
 0x135   : > { %v493_v35 = vsub.f32 %v461_v47, %v477_v39  ;;  %v462_v40 = vadd.f32 %v2939_v28, %v2865_v42  ;;  %v543_v18 = vmul.f32 1.442695, %v520_v36  ;;  %2293 = vpow2.f32 %v541_v14 }
 0x136   : > { %v340_v11 = vpop.f32.mrf.mxu0  ;;  %v539_v51 = vmul.f32 1.442695, %v518_v63  ;;  %v522_v19 = vmul.f32 -0.15625, %v506_v29  ;;  %v463_v8 = vadd.f32 %v2939_v28, %v2896_v55  ;;  %v508_v37 = vmax.f32 %v492_v61, 0.0 }
 0x137   : > { %v479_v13 = vmul.f32 2.0, %v340_v11  ;;  %v494_v21 = vsub.f32 %v462_v40, %v478_v1  ;;  %v480_v58 = vmul.f32 2.0, %v2026_v27  ;;  %v545_v3 = vmul.f32 1.442695, %v521_v20 }
 0x138   : > { %2295 = vpow2.f32 %v539_v51  ;;  %v523_v44 = vmul.f32 -0.15625, %v507_v41  ;;  %v509_v0 = vmax.f32 %v493_v35, 0.0  ;;  %v464_v42 = vadd.f32 %v2939_v28, %v2868_v43 }
 0x139   : > { %v495_v24 = vsub.f32 %v463_v8, %v479_v13  ;;  %2297 = vpow2.f32 %v543_v18  ;;  %v547_v55 = vmul.f32 1.442695, %v522_v19  ;;  %v524_v27 = vmul.f32 -0.15625, %v508_v37 }
 0x13a   : > { %v510_v34 = vmax.f32 %v494_v21, 0.0  ;;  %v496_v2 = vsub.f32 %v464_v42, %v480_v58  ;;  %2299 = vpow2.f32 %v545_v3  ;;  %v549_v15 = vmul.f32 1.442695, %v523_v44 }
 0x13b   : > { %v2284_v7 = vpop.eup %2283  ;;  %v525_v12 = vmul.f32 -0.15625, %v509_v0  ;;  %v511_v38 = vmax.f32 %v495_v24, 0.0  ;;  %2301 = vpow2.f32 %v547_v55  ;;  %v551_v22 = vmul.f32 1.442695, %v524_v27 }
 0x13c   : > { %2059 = vmatprep.mubr.f32.mxu1 %v2284_v7  ;;  %v2286_v54 = vpop.eup %2285  ;;  %v526_v17 = vmul.f32 -0.15625, %v510_v34  ;;  %v512_v9 = vmax.f32 %v496_v2, 0.0  ;;  %2303 = vpow2.f32 %v549_v15 }
 0x13d   : > { %2060 = vmatmul.mubr.f32.vlgmr.msra.gmra.mxu1 %v2286_v54  ;;  %v2288_v57 = vpop.eup %2287  ;;  %v553_v39 = vmul.f32 1.442695, %v525_v12  ;;  %v527_v60 = vmul.f32 -0.15625, %v511_v38  ;;  %2305 = vpow2.f32 %v551_v22 }
 0x13e   : > { %2084 = vmatpush3.xpose.msk.msra.mxu1 %vm155_vm0, %v2765_v31  ;;  %2062 = vmatprep.mubr.f32.mxu1 %v2288_v57  ;;  %v555_v11 = vmul.f32 1.442695, %v526_v17  ;;  %v528_v5 = vmul.f32 -0.15625, %v512_v9 }
 0x13f   : > { %2085 = vmatprep.subr.msk.mxu1 %vm155_vm0, %v2778_v32  ;;  %2307 = vpow2.f32 %v553_v39  ;;  %v557_v14 = vmul.f32 1.442695, %v527_v60 }
 0x140   : > { %v2290_v43 = vpop.eup %2289  ;;  %2309 = vpow2.f32 %v555_v11  ;;  %v559_v61 = vmul.f32 1.442695, %v528_v5 }
 0x141   : > { %v2292_v28 = vpop.eup %2291  ;;  %2063 = vmatmul.mubr.f32.gmra.mxu1 %v2290_v43  ;;  %2311 = vpow2.f32 %v557_v14 }
 0x142   : > { %2086 = vmatpush3.xpose.msk.msra.mxu1 %vm155_vm0, %v2778_v32  ;;  %2065 = vmatprep.mubr.f32.mxu1 %v2292_v28  ;;  %v2294_v47 = vpop.eup %2293  ;;  %2313 = vpow2.f32 %v559_v61  ;;  %v3413_v61 = vsub.s32 0, %v2934_v4 }
 0x143   : > { %2087 = vmatprep.subr.msk.mxu1 %vm155_vm0, %v2782_v33 }
 0x145   : > { %v2296_v36 = vpop.eup %2295 }
 0x146   : > { %2088 = vmatpush3.xpose.msk.msra.mxu1 %vm155_vm0, %v2782_v33  ;;  %v2298_v29 = vpop.eup %2297 }
 0x147   : > { %2089 = vmatprep.subr.msk.mxu1 %vm155_vm0, %v2762_v30  ;;  %2066 = vmatmul.mubr.f32.gmra.mxu1 %v2296_v36  ;;  %v2300_v1 = vpop.eup %2299 }
 0x148   : > { %2068 = vmatprep.mubr.f32.mxu1 %v2294_v47  ;;  %v2302_v63 = vpop.eup %2301 }
 0x149   : > { %v2304_v7 = vpop.eup %2303 }
 0x14a   : > { %2090 = vmatpush3.xpose.msk.msra.mxu1 %vm155_vm0, %v2762_v30  ;;  %v2306_v20 = vpop.eup %2305 }
 0x14b   : > { %2091 = vmatprep.subr.msk.mxu1 %vm155_vm0, %v2752_v26  ;;  %2069 = vmatmul.mubr.f32.gmra.mxu1 %v2298_v29  ;;  %v1049_v29 = vpop.trf.xlu1 }
 0x14c   : > { %2071 = vmatprep.mubr.f32.mxu1 %v2300_v1  ;;  %v2308_v41 = vpop.eup %2307  ;;  %v3142_v1 = vrot.slane %v1049_v29, %v3413_v61 }
 0x14d   : > { %v2310_v35 = vpop.eup %2309 }
 0x14e   : > { %2092 = vmatpush3.xpose.msk.msra.mxu1 %vm155_vm0, %v2752_v26  ;;  %v2312_v13 = vpop.eup %2311 }
 0x14f   : > { %2093 = vmatprep.subr.msk.mxu1 %vm155_vm0, %v2742_v25  ;;  %2072 = vmatmul.mubr.f32.gmra.mxu1 %v2302_v63  ;;  %v2314_v40 = vpop.eup %2313 }
 0x150   : > { %2074 = vmatprep.mubr.f32.mxu1 %v2304_v7  ;;  %v1070_v7 = vadd.f32 %v3142_v1, %v2879_v48 }
 0x152   : > { %2094 = vmatpush3.xpose.msk.msra.mxu1 %vm155_vm0, %v2742_v25 }
 0x153   : > { %2095 = vmatprep.subr.msk.mxu1 %vm155_vm0, %v2732_v23  ;;  %2075 = vmatmul.mubr.f32.gmra.mxu1 %v2306_v20 }
 0x154   : > { %2077 = vmatprep.mubr.f32.mxu1 %v2308_v41 }
 0x156   : > { %2096 = vmatpush3.xpose.msk.msra.mxu1 %vm155_vm0, %v2732_v23 }
 0x157   : > { %2097 = vmatprep.subr.msk.mxu1 %vm155_vm0, %v2724_v16  ;;  %2078 = vmatmul.mubr.f32.gmra.mxu1 %v2310_v35 }
 0x158   : > { %2080 = vmatprep.mubr.f32.mxu1 %v2312_v13  ;;  %v1069_v13 = vadd.f32 %v3142_v1, %v2873_v45 }
 0x15a   : > { %2098 = vmatpush3.xpose.msk.msra.mxu1 %vm155_vm0, %v2724_v16 }
 0x15b   : > { %2099 = vmatprep.subr.msk.mxu1 %vm155_vm0, %v2714_v10  ;;  %2081 = vmatmul.mubr.f32.gmra.mxu1 %v2314_v40 }
 0x15c   : > { %2115 = vmatprep.mubr.msk.f32.mxu1 %vm155_vm0, %v2637_v46 }
 0x15e   : > { %2100 = vmatpush3.xpose.msk.msra.mxu1 %vm155_vm0, %v2714_v10 }
 0x15f   : > { %2101 = vmatprep.subr.msk.mxu1 %vm155_vm0, %v2704_v6 }
 0x162   : > { %2102 = vmatpush3.xpose.msk.msra.mxu1 %vm155_vm0, %v2704_v6 }
 0x163   : > { %2103 = vmatprep.subr.msk.mxu1 %vm155_vm0, %v2694_v62 }
 0x166   : > { %2104 = vmatpush3.xpose.msk.msra.mxu1 %vm155_vm0, %v2694_v62 }
 0x167   : > { %2105 = vmatprep.subr.msk.mxu1 %vm155_vm0, %v2684_v59 }
 0x16a   : > { %2106 = vmatpush3.xpose.msk.msra.mxu1 %vm155_vm0, %v2684_v59 }
 0x16b   : > { %2107 = vmatprep.subr.msk.mxu1 %vm155_vm0, %v2674_v56 }
 0x16e   : > { %2108 = vmatpush3.xpose.msk.msra.mxu1 %vm155_vm0, %v2674_v56 }
 0x16f   : > { %2109 = vmatprep.subr.msk.mxu1 %vm155_vm0, %v2664_v53 }
 0x172   : > { %2110 = vmatpush3.xpose.msk.msra.mxu1 %vm155_vm0, %v2664_v53 }
 0x173   : > { %2111 = vmatprep.subr.msk.mxu1 %vm155_vm0, %v2652_v50 }
 0x176   : > { %2112 = vmatpush3.xpose.msk.msra.mxu1 %vm155_vm0, %v2652_v50 }
 0x177   : > { %2113 = vmatprep.subr.msk.mxu1 %vm155_vm0, %v2637_v46 }
 0x17a   : > { %2114 = vmatpush3.xpose.msk.msra.mxu1 %vm155_vm0, %v2637_v46  ;;  %v3071_v46 = vstv %s723_s22 }
 0x17b   : > { %vm725_vm1 = vcmp.eq.s32.totalorder %v3071_v46, 1 }
 0x17d   : > { %2116 = vmatmul.mubr.msk.f32.vlgmr.msra.gmra.mxu1 %vm155_vm0, %v2652_v50 }
 0x17e   : > { %2118 = vmatprep.mubr.msk.f32.mxu1 %vm155_vm0, %v2664_v53 }
 0x181   : > { %2119 = vmatmul.mubr.msk.f32.gmra.mxu1 %vm155_vm0, %v2674_v56 }
 0x182   : > { %2121 = vmatprep.mubr.msk.f32.mxu1 %vm155_vm0, %v2684_v59 }
 0x185   : > { %2122 = vmatmul.mubr.msk.f32.gmra.mxu1 %vm155_vm0, %v2694_v62 }
 0x186   : > { %2124 = vmatprep.mubr.msk.f32.mxu1 %vm155_vm0, %v2704_v6 }
 0x189   : > { %2125 = vmatmul.mubr.msk.f32.gmra.mxu1 %vm155_vm0, %v2714_v10 }
 0x18a   : > { %2127 = vmatprep.mubr.msk.f32.mxu1 %vm155_vm0, %v2724_v16 }
 0x18d   : > { %2128 = vmatmul.mubr.msk.f32.gmra.mxu1 %vm155_vm0, %v2732_v23 }
 0x18e   : > { %2130 = vmatprep.mubr.msk.f32.mxu1 %vm155_vm0, %v2742_v25 }
 0x191   : > { %2131 = vmatmul.mubr.msk.f32.gmra.mxu1 %vm155_vm0, %v2752_v26 }
 0x192   : > { %2133 = vmatprep.mubr.msk.f32.mxu1 %vm155_vm0, %v2762_v30 }
 0x195   : > { %2134 = vmatmul.mubr.msk.f32.gmra.mxu1 %vm155_vm0, %v2782_v33 }
 0x196   : > { %2136 = vmatprep.mubr.msk.f32.mxu1 %vm155_vm0, %v2778_v32 }
 0x199   : > { %2137 = vmatmul.mubr.msk.f32.gmra.mxu1 %vm155_vm0, %v2765_v31 }
 0x1fd   : > { %v2061_v50 = vpop.f32.mrf.mxu1 }
 0x1fe   : > { %v707_v53 = vmul.f32 0.0078125, %v2061_v50 }
 0x1ff   : > { %v627_v56 = vpop.f32.mrf.mxu1 }
 0x200   : > { %v727_v59 = vsel %vm725_vm1, %v707_v53, 0.0  ;;  %v706_v62 = vmul.f32 0.0078125, %v627_v56  ;;  %v1072_v56 = vadd.f32 %v3142_v1, %v2890_v52 }
 0x201   : > { %743 = vst.msk [vmem:[%s3076_s25 + $0x8] sm:$0xff] %vm155_vm0, %v727_v59  ;;  %v2064_v10 = vpop.f32.mrf.mxu1 }
 0x202   : > { %v726_v6 = vsel %vm725_vm1, %v706_v62, 0.0  ;;  %v709_v16 = vmul.f32 0.0078125, %v2064_v10  ;;  %v1071_v62 = vadd.f32 %v3142_v1, %v2884_v49 }
 0x203   : > { %742 = vst.msk [vmem:[%s3076_s25] sm:$0xff] %vm155_vm0, %v726_v6  ;;  %v637_v23 = vpop.f32.mrf.mxu1 }
 0x204   : > { %v729_v25 = vsel %vm725_vm1, %v709_v16, 0.0  ;;  %v708_v26 = vmul.f32 0.0078125, %v637_v23 }
 0x205   : > { %745 = vst.msk [vmem:[%s3076_s25 + $0x18] sm:$0xff] %vm155_vm0, %v729_v25 }
 0x206   : > { %v728_v30 = vsel %vm725_vm1, %v708_v26, 0.0 }
 0x207   : > { %744 = vst.msk [vmem:[%s3076_s25 + $0x10] sm:$0xff] %vm155_vm0, %v728_v30  ;;  %v2067_v31 = vpop.f32.mrf.mxu1 }
 0x208   : > { %v711_v32 = vmul.f32 0.0078125, %v2067_v31  ;;  %v3414_v31 = vld [vmem:[#allocation4_spill] sm:$0xff] }
 0x209   : > { %v647_v33 = vpop.f32.mrf.mxu1 }
 0x20a   : > { %v731_v51 = vsel %vm725_vm1, %v711_v32, 0.0  ;;  %v710_v54 = vmul.f32 0.0078125, %v647_v33  ;;  %v1074_v32 = vadd.f32 %v3142_v1, %v3414_v31 }
 0x20b   : > { %747 = vst.msk [vmem:[%s3076_s25 + $0x28] sm:$0xff] %vm155_vm0, %v731_v51  ;;  %v2070_v18 = vpop.f32.mrf.mxu1 }
 0x20c   : > { %v730_v19 = vsel %vm725_vm1, %v710_v54, 0.0  ;;  %v713_v8 = vmul.f32 0.0078125, %v2070_v18 }
 0x20d   : > { %746 = vst.msk [vmem:[%s3076_s25 + $0x20] sm:$0xff] %vm155_vm0, %v730_v19  ;;  %v657_v37 = vpop.f32.mrf.mxu1 }
 0x20e   : > { %v733_v21 = vsel %vm725_vm1, %v713_v8, 0.0  ;;  %v712_v58 = vmul.f32 0.0078125, %v657_v37  ;;  %v3415_v8 = vld [vmem:[#allocation3_spill] sm:$0xff] }
 0x20f   : > { %749 = vst.msk [vmem:[%s3076_s25 + $0x38] sm:$0xff] %vm155_vm0, %v733_v21  ;;  %v2073_v57 = vpop.f32.mrf.mxu1  ;;  %v1073_v49 = vadd.f32 %v3142_v1, %v3415_v8 }
 0x210   : > { %v732_v3 = vsel %vm725_vm1, %v712_v58, 0.0  ;;  %v715_v44 = vmul.f32 0.0078125, %v2073_v57  ;;  %v3416_v57 = vld [vmem:[#allocation6_spill] sm:$0xff] }
 0x211   : > { %748 = vst.msk [vmem:[%s3076_s25 + $0x30] sm:$0xff] %vm155_vm0, %v732_v3  ;;  %v667_v0 = vpop.f32.mrf.mxu1  ;;  %v1076_v3 = vadd.f32 %v3142_v1, %v3416_v57 }
 0x212   : > { %v735_v24 = vsel %vm725_vm1, %v715_v44, 0.0  ;;  %v714_v42 = vmul.f32 0.0078125, %v667_v0 }
 0x213   : > { %751 = vst.msk [vmem:[%s3076_s25 + $0x48] sm:$0xff] %vm155_vm0, %v735_v24  ;;  %v2076_v55 = vpop.f32.mrf.mxu1 }
 0x214   : > { %v734_v27 = vsel %vm725_vm1, %v714_v42, 0.0  ;;  %v717_v34 = vmul.f32 0.0078125, %v2076_v55 }
 0x215   : > { %750 = vst.msk [vmem:[%s3076_s25 + $0x40] sm:$0xff] %vm155_vm0, %v734_v27  ;;  %v677_v2 = vpop.f32.mrf.mxu1 }
 0x216   : > { %v737_v15 = vsel %vm725_vm1, %v717_v34, 0.0  ;;  %v716_v12 = vmul.f32 0.0078125, %v677_v2  ;;  %v3417_v2 = vld [vmem:[#allocation5_spill] sm:$0xff] }
 0x217   : > { %753 = vst.msk [vmem:[%s3076_s25 + $0x58] sm:$0xff] %vm155_vm0, %v737_v15  ;;  %v2079_v38 = vpop.f32.mrf.mxu1  ;;  %v1075_v15 = vadd.f32 %v3142_v1, %v3417_v2 }
 0x218   : > { %v736_v43 = vsel %vm725_vm1, %v716_v12, 0.0  ;;  %v719_v28 = vmul.f32 0.0078125, %v2079_v38 }
 0x219   : > { %752 = vst.msk [vmem:[%s3076_s25 + $0x50] sm:$0xff] %vm155_vm0, %v736_v43  ;;  %v687_v22 = vpop.f32.mrf.mxu1 }
 0x21a   : > { %v739_v17 = vsel %vm725_vm1, %v719_v28, 0.0  ;;  %v718_v9 = vmul.f32 0.0078125, %v687_v22  ;;  %v3418_v22 = vld [vmem:[#allocation8_spill] sm:$0xff] }
 0x21b   : > { %755 = vst.msk [vmem:[%s3076_s25 + $0x68] sm:$0xff] %vm155_vm0, %v739_v17  ;;  %v2082_v39 = vpop.f32.mrf.mxu1  ;;  %v1078_v17 = vadd.f32 %v3142_v1, %v3418_v22 }
 0x21c   : > { %v738_v60 = vsel %vm725_vm1, %v718_v9, 0.0  ;;  %v721_v47 = vmul.f32 0.0078125, %v2082_v39 }
 0x21d   : > { %754 = vst.msk [vmem:[%s3076_s25 + $0x60] sm:$0xff] %vm155_vm0, %v738_v60  ;;  %v697_v11 = vpop.f32.mrf.mxu1 }
 0x21e   : > { %v741_v5 = vsel %vm725_vm1, %v721_v47, 0.0  ;;  %v720_v36 = vmul.f32 0.0078125, %v697_v11 }
 0x21f   : > { %757 = vst.msk [vmem:[%s3076_s25 + $0x78] sm:$0xff] %vm155_vm0, %v741_v5 }
 0x220   : > { %v740_v14 = vsel %vm725_vm1, %v720_v36, 0.0  ;;  %v3419_v36 = vld [vmem:[#allocation7_spill] sm:$0xff] }
 0x221   : > { %756 = vst.msk [vmem:[%s3076_s25 + $0x70] sm:$0xff] %vm155_vm0, %v740_v14  ;;  %v1077_v14 = vadd.f32 %v3142_v1, %v3419_v36 }
 0x23d   : > { %v2117_v63 = vpop.f32.mrf.mxu1 }
 0x23e   : > { %v1086_v20 = vmul.f32 2.0, %v2117_v63 }
 0x23f   : > { %v890_v41 = vpop.f32.mrf.mxu1 }
 0x240   : > { %v1102_v35 = vsub.f32 %v1070_v7, %v1086_v20  ;;  %v1085_v40 = vmul.f32 2.0, %v890_v41 }
 0x241   : > { %v2120_v46 = vpop.f32.mrf.mxu1 }
 0x242   : > { %v1118_v50 = vmax.f32 %v1102_v35, 0.0  ;;  %v1101_v53 = vsub.f32 %v1069_v13, %v1085_v40  ;;  %v1088_v4 = vmul.f32 2.0, %v2120_v46  ;;  %v3420_v46 = vld [vmem:[#allocation10_spill] sm:$0xff] }
 0x243   : > { %v900_v59 = vpop.f32.mrf.mxu1 }
 0x244   : > { %v1134_v6 = vmul.f32 -0.15625, %v1118_v50  ;;  %v1117_v48 = vmax.f32 %v1101_v53, 0.0  ;;  %v1104_v10 = vsub.f32 %v1072_v56, %v1088_v4  ;;  %v1087_v16 = vmul.f32 2.0, %v900_v59 }
 0x245   : > { %v2123_v23 = vpop.f32.mrf.mxu1  ;;  %v1080_v50 = vadd.f32 %v3142_v1, %v3420_v46 }
 0x246   : > { %v1133_v25 = vmul.f32 -0.15625, %v1117_v48  ;;  %v1120_v26 = vmax.f32 %v1104_v10, 0.0  ;;  %v1103_v45 = vsub.f32 %v1071_v62, %v1087_v16  ;;  %v1151_v30 = vmul.f32 1.442695, %v1134_v6  ;;  %v3421_v10 = vld [vmem:[#allocation9_spill] sm:$0xff] }
 0x247   : > { %v1090_v33 = vmul.f32 2.0, %v2123_v23  ;;  %v910_v51 = vpop.f32.mrf.mxu1  ;;  %v1079_v16 = vadd.f32 %v3142_v1, %v3421_v10 }
 0x248   : > { %v1149_v52 = vmul.f32 1.442695, %v1133_v25  ;;  %v1136_v54 = vmul.f32 -0.15625, %v1120_v26  ;;  %v1119_v18 = vmax.f32 %v1103_v45, 0.0  ;;  %v1089_v37 = vmul.f32 2.0, %v910_v51  ;;  %v3422_v45 = vld [vmem:[#allocation12_spill] sm:$0xff] }
 0x249   : > { %v1106_v19 = vsub.f32 %v1074_v32, %v1090_v33  ;;  %v2126_v21 = vpop.f32.mrf.mxu1 }
 0x24a   : > { %2315 = vpow2.f32 %v1149_v52  ;;  %v1135_v58 = vmul.f32 -0.15625, %v1119_v18  ;;  %v1092_v44 = vmul.f32 2.0, %v2126_v21  ;;  %v1155_v0 = vmul.f32 1.442695, %v1136_v54  ;;  %v3423_v18 = vld [vmem:[#allocation11_spill] sm:$0xff] }
 0x24b   : > { %2317 = vpow2.f32 %v1151_v30  ;;  %v1122_v24 = vmax.f32 %v1106_v19, 0.0  ;;  %v1105_v42 = vsub.f32 %v1073_v49, %v1089_v37  ;;  %v920_v55 = vpop.f32.mrf.mxu1  ;;  %v1082_v30 = vadd.f32 %v3142_v1, %v3422_v45 }
 0x24c   : > { %v1153_v27 = vmul.f32 1.442695, %v1135_v58  ;;  %v1108_v34 = vsub.f32 %v1076_v3, %v1092_v44  ;;  %v1091_v12 = vmul.f32 2.0, %v920_v55  ;;  %v1081_v19 = vadd.f32 %v3142_v1, %v3423_v18  ;;  %v3424_v44 = vld [vmem:[#allocation14_spill] sm:$0xff] }
 0x24d   : > { %v1138_v38 = vmul.f32 -0.15625, %v1122_v24  ;;  %v1121_v43 = vmax.f32 %v1105_v42, 0.0  ;;  %v2129_v28 = vpop.f32.mrf.mxu1 }
 0x24e   : > { %2319 = vpow2.f32 %v1153_v27  ;;  %v1124_v9 = vmax.f32 %v1108_v34, 0.0  ;;  %v1107_v39 = vsub.f32 %v1075_v15, %v1091_v12  ;;  %v1094_v60 = vmul.f32 2.0, %v2129_v28  ;;  %v3425_v12 = vld [vmem:[#allocation13_spill] sm:$0xff] }
 0x24f   : > { %2321 = vpow2.f32 %v1155_v0  ;;  %v1159_v47 = vmul.f32 1.442695, %v1138_v38  ;;  %v1137_v11 = vmul.f32 -0.15625, %v1121_v43  ;;  %v930_v5 = vpop.f32.mrf.mxu1  ;;  %v1084_v0 = vadd.f32 %v3142_v1, %v3424_v44 }
 0x250   : > { %v1140_v29 = vmul.f32 -0.15625, %v1124_v9  ;;  %v1123_v61 = vmax.f32 %v1107_v39, 0.0  ;;  %v1110_v63 = vsub.f32 %v1078_v17, %v1094_v60  ;;  %v1093_v7 = vmul.f32 2.0, %v930_v5 }
 0x251   : > { %v1157_v20 = vmul.f32 1.442695, %v1137_v11  ;;  %v2132_v41 = vpop.f32.mrf.mxu1  ;;  %2323 = vpow2.f32 %v1159_v47  ;;  %v1083_v38 = vadd.f32 %v3142_v1, %v3425_v12 }
 0x252   : > { %v1139_v35 = vmul.f32 -0.15625, %v1123_v61  ;;  %v1126_v13 = vmax.f32 %v1110_v63, 0.0  ;;  %v1109_v40 = vsub.f32 %v1077_v14, %v1093_v7  ;;  %v1096_v53 = vmul.f32 2.0, %v2132_v41 }
 0x253   : > { %2325 = vpow2.f32 %v1157_v20  ;;  %v940_v56 = vpop.f32.mrf.mxu1  ;;  %v1163_v4 = vmul.f32 1.442695, %v1140_v29 }
 0x254   : > { %v1161_v59 = vmul.f32 1.442695, %v1139_v35  ;;  %v1142_v62 = vmul.f32 -0.15625, %v1126_v13  ;;  %v1125_v6 = vmax.f32 %v1109_v40, 0.0  ;;  %v1112_v48 = vsub.f32 %v1080_v50, %v1096_v53 }
 0x255   : > { %v1095_v23 = vmul.f32 2.0, %v940_v56  ;;  %v2135_v25 = vpop.f32.mrf.mxu1 }
 0x256   : > { %2327 = vpow2.f32 %v1161_v59  ;;  %v1141_v26 = vmul.f32 -0.15625, %v1125_v6  ;;  %v1098_v31 = vmul.f32 2.0, %v2135_v25  ;;  %v1167_v33 = vmul.f32 1.442695, %v1142_v62 }
 0x257   : > { %v2316_v32 = vpop.eup %2315  ;;  %v1128_v51 = vmax.f32 %v1112_v48, 0.0  ;;  %v1111_v52 = vsub.f32 %v1079_v16, %v1095_v23  ;;  %v950_v54 = vpop.f32.mrf.mxu1  ;;  %2329 = vpow2.f32 %v1163_v4  ;;  %v1344_v62 = vstv %s1343_s27 }
 0x258   : > { %v2318_v8 = vpop.eup %2317  ;;  %v1165_v49 = vmul.f32 1.442695, %v1141_v26  ;;  %v1114_v37 = vsub.f32 %v1082_v30, %v1098_v31  ;;  %v1097_v21 = vmul.f32 2.0, %v950_v54  ;;  %2171 = vmatprep.mubr.f32.mxu0 %v2316_v32  ;;  %vm3178_vm2 = vcmp.eq.s32.totalorder %v1344_v62, 1 }
 0x259   : > { %v1144_v58 = vmul.f32 -0.15625, %v1128_v51  ;;  %v1127_v57 = vmax.f32 %v1111_v52, 0.0  ;;  %v2138_v3 = vpop.f32.mrf.mxu1  ;;  %2172 = vmatmul.mubr.f32.vlgmr.msra.gmra.mxu0 %v2318_v8 }
 0x25a   : > { %2331 = vpow2.f32 %v1165_v49  ;;  %v1130_v24 = vmax.f32 %v1114_v37, 0.0  ;;  %v1113_v42 = vsub.f32 %v1081_v19, %v1097_v21  ;;  %v1100_v55 = vmul.f32 2.0, %v2138_v3 }
 0x25b   : > { %v2320_v27 = vpop.eup %2319  ;;  %2333 = vpow2.f32 %v1167_v33  ;;  %v1171_v34 = vmul.f32 1.442695, %v1144_v58  ;;  %v1143_v2 = vmul.f32 -0.15625, %v1127_v57  ;;  %v960_v15 = vpop.f32.mrf.mxu1 }
 0x25c   : > { %v2322_v43 = vpop.eup %2321  ;;  %v1146_v28 = vmul.f32 -0.15625, %v1130_v24  ;;  %v1129_v22 = vmax.f32 %v1113_v42, 0.0  ;;  %v1116_v17 = vsub.f32 %v1084_v0, %v1100_v55  ;;  %v1099_v9 = vmul.f32 2.0, %v960_v15  ;;  %2174 = vmatprep.mubr.f32.mxu0 %v2320_v27 }
 0x25d   : > { %v1169_v39 = vmul.f32 1.442695, %v1143_v2  ;;  %2175 = vmatmul.mubr.f32.gmra.mxu0 %v2322_v43  ;;  %2335 = vpow2.f32 %v1171_v34 }
 0x25e   : > { %v1145_v60 = vmul.f32 -0.15625, %v1129_v22  ;;  %v1132_v47 = vmax.f32 %v1116_v17, 0.0  ;;  %v1115_v11 = vsub.f32 %v1083_v38, %v1099_v9  ;;  %v2324_v5 = vpop.eup %2323  ;;  %v1175_v14 = vmul.f32 1.442695, %v1146_v28 }
 0x25f   : > { %2337 = vpow2.f32 %v1169_v39 }
 0x260   : > { %v2326_v36 = vpop.eup %2325  ;;  %v1173_v29 = vmul.f32 1.442695, %v1145_v60  ;;  %v1148_v61 = vmul.f32 -0.15625, %v1132_v47  ;;  %v1131_v63 = vmax.f32 %v1115_v11, 0.0 }
 0x261   : > { %2177 = vmatprep.mubr.f32.mxu0 %v2326_v36 }
 0x262   : > { %2339 = vpow2.f32 %v1173_v29  ;;  %v1147_v1 = vmul.f32 -0.15625, %v1131_v63  ;;  %2178 = vmatmul.mubr.f32.gmra.mxu0 %v2324_v5  ;;  %v1179_v20 = vmul.f32 1.442695, %v1148_v61 }
 0x263   : > { %v2328_v7 = vpop.eup %2327  ;;  %2341 = vpow2.f32 %v1175_v14 }
 0x264   : > { %v1177_v41 = vmul.f32 1.442695, %v1147_v1  ;;  %2180 = vmatprep.mubr.f32.mxu0 %v2328_v7  ;;  %v2330_v35 = vpop.eup %2329 }
 0x266   : > { %2343 = vpow2.f32 %v1177_v41  ;;  %2181 = vmatmul.mubr.f32.gmra.mxu0 %v2330_v35 }
 0x267   : > { %v2332_v13 = vpop.eup %2331  ;;  %2345 = vpow2.f32 %v1179_v20 }
 0x268   : > { %v2334_v40 = vpop.eup %2333  ;;  %2183 = vmatprep.mubr.f32.mxu0 %v2332_v13 }
 0x26a   : > { %2184 = vmatmul.mubr.f32.gmra.mxu0 %v2334_v40  ;;  %v2336_v46 = vpop.eup %2335 }
 0x26c   : > { %v2338_v50 = vpop.eup %2337 }
 0x26d   : > { %2186 = vmatprep.mubr.f32.mxu0 %v2338_v50 }
 0x26e   : > { %2187 = vmatmul.mubr.f32.gmra.mxu0 %v2336_v46 }
 0x26f   : > { %v2340_v53 = vpop.eup %2339 }
 0x270   : > { %2189 = vmatprep.mubr.f32.mxu0 %v2340_v53  ;;  %v2342_v56 = vpop.eup %2341 }
 0x272   : > { %2190 = vmatmul.mubr.f32.gmra.mxu0 %v2342_v56 }
 0x273   : > { %v2344_v4 = vpop.eup %2343 }
 0x274   : > { %2192 = vmatprep.mubr.f32.mxu0 %v2344_v4  ;;  %v2346_v59 = vpop.eup %2345 }
 0x276   : > { %2193 = vmatmul.mubr.f32.gmra.mxu0 %v2346_v59 }
 0x319   : > { %v2173_v6 = vpop.f32.mrf.mxu0 }
 0x31a   : > { %v1327_v10 = vmul.f32 0.0078125, %v2173_v6 }
 0x31b   : > { %v1247_v16 = vpop.f32.mrf.mxu0 }
 0x31c   : > { %v1347_v23 = vsel %vm3178_vm2, %v1327_v10, 0.0  ;;  %v1326_v25 = vmul.f32 0.0078125, %v1247_v16 }
 0x31d   : > { %1808 = vst.msk [vmem:[%s3076_s25 + $0x88] sm:$0xff] %vm155_vm0, %v1347_v23  ;;  %v2176_v26 = vpop.f32.mrf.mxu0 }
 0x31e   : > { %v1346_v45 = vsel %vm3178_vm2, %v1326_v25, 0.0  ;;  %v1329_v30 = vmul.f32 0.0078125, %v2176_v26 }
 0x31f   : > { %1807 = vst.msk [vmem:[%s3076_s25 + $0x80] sm:$0xff] %vm155_vm0, %v1346_v45  ;;  %v1257_v31 = vpop.f32.mrf.mxu0 }
 0x320   : > { %v1349_v32 = vsel %vm3178_vm2, %v1329_v30, 0.0  ;;  %v1328_v33 = vmul.f32 0.0078125, %v1257_v31 }
 0x321   : > { %1810 = vst.msk [vmem:[%s3076_s25 + $0x98] sm:$0xff] %vm155_vm0, %v1349_v32 }
 0x322   : > { %v1348_v51 = vsel %vm3178_vm2, %v1328_v33, 0.0  ;;  %v2179_v52 = vpop.f32.mrf.mxu0 }
 0x323   : > { %1809 = vst.msk [vmem:[%s3076_s25 + $0x90] sm:$0xff] %vm155_vm0, %v1348_v51  ;;  %v1331_v54 = vmul.f32 0.0078125, %v2179_v52 }
 0x324   : > { %v1267_v18 = vpop.f32.mrf.mxu0 }
 0x325   : > { %v1351_v19 = vsel %vm3178_vm2, %v1331_v54, 0.0  ;;  %v1330_v8 = vmul.f32 0.0078125, %v1267_v18 }
 0x326   : > { %1812 = vst.msk [vmem:[%s3076_s25 + $0xa8] sm:$0xff] %vm155_vm0, %v1351_v19  ;;  %v2182_v49 = vpop.f32.mrf.mxu0 }
 0x327   : > { %v1350_v37 = vsel %vm3178_vm2, %v1330_v8, 0.0  ;;  %v1333_v21 = vmul.f32 0.0078125, %v2182_v49 }
 0x328   : > { %1811 = vst.msk [vmem:[%s3076_s25 + $0xa0] sm:$0xff] %vm155_vm0, %v1350_v37  ;;  %v1277_v58 = vpop.f32.mrf.mxu0 }
 0x329   : > { %v1353_v57 = vsel %vm3178_vm2, %v1333_v21, 0.0  ;;  %v1332_v3 = vmul.f32 0.0078125, %v1277_v58 }
 0x32a   : > { %1814 = vst.msk [vmem:[%s3076_s25 + $0xb8] sm:$0xff] %vm155_vm0, %v1353_v57  ;;  %v2185_v44 = vpop.f32.mrf.mxu0 }
 0x32b   : > { %v1352_v0 = vsel %vm3178_vm2, %v1332_v3, 0.0  ;;  %v1335_v24 = vmul.f32 0.0078125, %v2185_v44 }
 0x32c   : > { %1813 = vst.msk [vmem:[%s3076_s25 + $0xb0] sm:$0xff] %vm155_vm0, %v1352_v0  ;;  %v1287_v42 = vpop.f32.mrf.mxu0 }
 0x32d   : > { %v1355_v55 = vsel %vm3178_vm2, %v1335_v24, 0.0  ;;  %v1334_v27 = vmul.f32 0.0078125, %v1287_v42 }
 0x32e   : > { %1816 = vst.msk [vmem:[%s3076_s25 + $0xc8] sm:$0xff] %vm155_vm0, %v1355_v55  ;;  %v2188_v34 = vpop.f32.mrf.mxu0 }
 0x32f   : > { %v1354_v2 = vsel %vm3178_vm2, %v1334_v27, 0.0  ;;  %v1337_v15 = vmul.f32 0.0078125, %v2188_v34 }
 0x330   : > { %1815 = vst.msk [vmem:[%s3076_s25 + $0xc0] sm:$0xff] %vm155_vm0, %v1354_v2  ;;  %v1297_v12 = vpop.f32.mrf.mxu0 }
 0x331   : > { %v1357_v38 = vsel %vm3178_vm2, %v1337_v15, 0.0  ;;  %v1336_v43 = vmul.f32 0.0078125, %v1297_v12 }
 0x332   : > { %1818 = vst.msk [vmem:[%s3076_s25 + $0xd8] sm:$0xff] %vm155_vm0, %v1357_v38  ;;  %v2191_v28 = vpop.f32.mrf.mxu0 }
 0x333   : > { %v1356_v22 = vsel %vm3178_vm2, %v1336_v43, 0.0  ;;  %v1339_v17 = vmul.f32 0.0078125, %v2191_v28 }
 0x334   : > { %1817 = vst.msk [vmem:[%s3076_s25 + $0xd0] sm:$0xff] %vm155_vm0, %v1356_v22  ;;  %v1307_v9 = vpop.f32.mrf.mxu0 }
 0x335   : > { %v1359_v39 = vsel %vm3178_vm2, %v1339_v17, 0.0  ;;  %v1338_v60 = vmul.f32 0.0078125, %v1307_v9 }
 0x336   : > { %1820 = vst.msk [vmem:[%s3076_s25 + $0xe8] sm:$0xff] %vm155_vm0, %v1359_v39  ;;  %v2194_v47 = vpop.f32.mrf.mxu0 }
 0x337   : > { %v1358_v11 = vsel %vm3178_vm2, %v1338_v60, 0.0  ;;  %v1341_v5 = vmul.f32 0.0078125, %v2194_v47 }
 0x338   : > { %1819 = vst.msk [vmem:[%s3076_s25 + $0xe0] sm:$0xff] %vm155_vm0, %v1358_v11  ;;  %v1317_v36 = vpop.f32.mrf.mxu0  ;;  %1385 = sbr.rel (!%p2470_p4) target bundleno = 877 (0x36d), region = 28 }
 0x339   : > { %v1361_v14 = vsel %vm3178_vm2, %v1341_v5, 0.0  ;;  %v1340_v29 = vmul.f32 0.0078125, %v1317_v36 }
 0x33a   : > { %1822 = vst.msk [vmem:[%s3076_s25 + $0xf8] sm:$0xff] %vm155_vm0, %v1361_v14 }
 0x33b   : > { %v1360_v61 = vsel %vm3178_vm2, %v1340_v29, 0.0 }
 0x33c   : > { %1821 = vst.msk [vmem:[%s3076_s25 + $0xf0] sm:$0xff] %vm155_vm0, %v1360_v61 }
 0x33d   : > { %s3437_s28 = smov (!%p1388_p10, %s1387_s28), 32 }
 0x33e   : > { %s1825_s4 = sshll.u32 %s3437_s28, 7 }
 0x33f   : > { %p1828_p11 = scmp.eq.s32.totalorder %s1825_s4, 0 }
 0x340   : > { %s3259_s5 = sshrl.u32 (!%p1828_p11), %s3437_s28, 5 }
 0x341   : > { %1396 = sbr.rel (%p1828_p11) target bundleno = 877 (0x36d), region = 32  ;;  %p1829_p12 = scmp.le.s32.totalorder (!%p1828_p11), %s3259_s5, 0 }
 0x346   : > { %1675 = sbr.rel (%p1829_p12) target bundleno = 860 (0x35c), region = 110  ;;  %s3428_s6 = smov (!%p1829_p12), %s3253_s3 }
 0x347   : > { %s3429_s8 = smov (!%p1829_p12), %s3076_s25  ;;  %s3268_s9 = smov (!%p1829_p12), 0  }
 0x348   : > { %s3270_s11 = smov (!%p1829_p12), 0  }
 0x34b LB: >> { %v1521_v63 = vld [vmem:[%s2409_s8] sm:$0xff]  ;;  %v1523_v1 = vld [vmem:[%s2409_s8 + $0x8] sm:$0xff]  ;;  %v1525_v7 = vld [vmem:[%s2409_s8 + $0x10] sm:$0xff]  ;;  %s1585_s12 = sadd.s32 1, %s2413_s9  ;;  %s1515_s11 = sadd.s32 1, %s2417_s11   ;;  %s2417_s11 = sphi %s3270_s11, %s1515_s11   ;;  %s2413_s9 = sphi %s3268_s9, %s3432_s9   ;;  %s2409_s8 = sphi %s3429_s8, %s3431_s8   ;;  %s2405_s6 = sphi %s3428_s6, %s3430_s6  }
 0x34c   : >> { %1522 = vst [vmem:[%s2405_s6] sm:$0xff] %v1521_v63  ;;  %1524 = vst [vmem:[%s2405_s6 + $0x8] sm:$0xff] %v1523_v1  ;;  %v1527_v20 = vld [vmem:[%s2409_s8 + $0x18] sm:$0xff]  ;;  %v1529_v41 = vld [vmem:[%s2409_s8 + $0x20] sm:$0xff]  ;;  %p1586_p13 = scmp.ge.s32.totalorder %s1585_s12, %s3259_s5  ;;  %p1514_p0 = scmp.ge.s32.totalorder %s1515_s11, %s3259_s5 }
 0x34d   : >> { %1526 = vst [vmem:[%s2405_s6 + $0x10] sm:$0xff] %v1525_v7  ;;  %v1531_v35 = vld [vmem:[%s2409_s8 + $0x28] sm:$0xff]  ;;  %1528 = vst [vmem:[%s2405_s6 + $0x18] sm:$0xff] %v1527_v20  ;;  %v1533_v13 = vld [vmem:[%s2409_s8 + $0x30] sm:$0xff] }
 0x34e   : >> { %1530 = vst [vmem:[%s2405_s6 + $0x20] sm:$0xff] %v1529_v41  ;;  %1532 = vst [vmem:[%s2405_s6 + $0x28] sm:$0xff] %v1531_v35  ;;  %v1535_v40 = vld [vmem:[%s2409_s8 + $0x38] sm:$0xff]  ;;  %v1537_v46 = vld [vmem:[%s2409_s8 + $0x40] sm:$0xff]  ;;  %s3439_s12 = smov (%p1586_p13, %s1585_s12), 0 }
 0x34f   : >> { %1534 = vst [vmem:[%s2405_s6 + $0x30] sm:$0xff] %v1533_v13  ;;  %1536 = vst [vmem:[%s2405_s6 + $0x38] sm:$0xff] %v1535_v40  ;;  %v1539_v50 = vld [vmem:[%s2409_s8 + $0x48] sm:$0xff]  ;;  %v1541_v53 = vld [vmem:[%s2409_s8 + $0x50] sm:$0xff]  ;;  %s1830_s14 = sshll.u32 %s3439_s12, 8  ;;  %s3432_s9 = smov %s3439_s12 }
 0x350   : >> { %1538 = vst [vmem:[%s2405_s6 + $0x40] sm:$0xff] %v1537_v46  ;;  %v1543_v56 = vld [vmem:[%s2409_s8 + $0x58] sm:$0xff]  ;;  %1540 = vst [vmem:[%s2405_s6 + $0x48] sm:$0xff] %v1539_v50  ;;  %v1545_v4 = vld [vmem:[%s2409_s8 + $0x60] sm:$0xff]  ;;  %s3326_s15 = scalar_lea.vmem %s3076_s25, %s1830_s14 [#allocation2]   ;;  %s1591_s16 = scalar_lea.vmem %s3253_s3, %s1830_s14  }
 0x351   : >> { %1542 = vst [vmem:[%s2405_s6 + $0x50] sm:$0xff] %v1541_v53  ;;  %1544 = vst [vmem:[%s2405_s6 + $0x58] sm:$0xff] %v1543_v56  ;;  %v1547_v59 = vld [vmem:[%s2409_s8 + $0x68] sm:$0xff]  ;;  %v1549_v62 = vld [vmem:[%s2409_s8 + $0x70] sm:$0xff] }
 0x352   : >> { %1546 = vst [vmem:[%s2405_s6 + $0x60] sm:$0xff] %v1545_v4  ;;  %1548 = vst [vmem:[%s2405_s6 + $0x68] sm:$0xff] %v1547_v59  ;;  %v1551_v6 = vld [vmem:[%s2409_s8 + $0x78] sm:$0xff]  ;;  %v1553_v48 = vld [vmem:[%s2409_s8 + $0x80] sm:$0xff] }
 0x353   : >> { %1550 = vst [vmem:[%s2405_s6 + $0x70] sm:$0xff] %v1549_v62  ;;  %v1555_v10 = vld [vmem:[%s2409_s8 + $0x88] sm:$0xff]  ;;  %1552 = vst [vmem:[%s2405_s6 + $0x78] sm:$0xff] %v1551_v6  ;;  %v1557_v16 = vld [vmem:[%s2409_s8 + $0x90] sm:$0xff] }
 0x354   : >> { %1554 = vst [vmem:[%s2405_s6 + $0x80] sm:$0xff] %v1553_v48  ;;  %1556 = vst [vmem:[%s2405_s6 + $0x88] sm:$0xff] %v1555_v10  ;;  %v1559_v23 = vld [vmem:[%s2409_s8 + $0x98] sm:$0xff]  ;;  %v1561_v25 = vld [vmem:[%s2409_s8 + $0xa0] sm:$0xff] }
 0x355   : >> { %1558 = vst [vmem:[%s2405_s6 + $0x90] sm:$0xff] %v1557_v16  ;;  %1560 = vst [vmem:[%s2405_s6 + $0x98] sm:$0xff] %v1559_v23  ;;  %v1563_v26 = vld [vmem:[%s2409_s8 + $0xa8] sm:$0xff]  ;;  %v1565_v45 = vld [vmem:[%s2409_s8 + $0xb0] sm:$0xff] }
 0x356   : >> { %1562 = vst [vmem:[%s2405_s6 + $0xa0] sm:$0xff] %v1561_v25  ;;  %v1567_v30 = vld [vmem:[%s2409_s8 + $0xb8] sm:$0xff]  ;;  %1564 = vst [vmem:[%s2405_s6 + $0xa8] sm:$0xff] %v1563_v26  ;;  %v1569_v31 = vld [vmem:[%s2409_s8 + $0xc0] sm:$0xff] }
 0x357   : >> { %1566 = vst [vmem:[%s2405_s6 + $0xb0] sm:$0xff] %v1565_v45  ;;  %1568 = vst [vmem:[%s2405_s6 + $0xb8] sm:$0xff] %v1567_v30  ;;  %v1571_v32 = vld [vmem:[%s2409_s8 + $0xc8] sm:$0xff]  ;;  %v1573_v33 = vld [vmem:[%s2409_s8 + $0xd0] sm:$0xff]  ;;  %1517 = sbr.rel (!%p1514_p0) target bundleno = 843 (0x34b), region = 116 }
 0x358   : >> { %1570 = vst [vmem:[%s2405_s6 + $0xc0] sm:$0xff] %v1569_v31  ;;  %1572 = vst [vmem:[%s2405_s6 + $0xc8] sm:$0xff] %v1571_v32  ;;  %v1575_v51 = vld [vmem:[%s2409_s8 + $0xd8] sm:$0xff]  ;;  %v1577_v52 = vld [vmem:[%s2409_s8 + $0xe0] sm:$0xff] }
 0x359   : >> { %1574 = vst [vmem:[%s2405_s6 + $0xd0] sm:$0xff] %v1573_v33  ;;  %v1579_v54 = vld [vmem:[%s2409_s8 + $0xe8] sm:$0xff]  ;;  %1576 = vst [vmem:[%s2405_s6 + $0xd8] sm:$0xff] %v1575_v51  ;;  %v1581_v18 = vld [vmem:[%s2409_s8 + $0xf0] sm:$0xff] }
 0x35a   : >> { %1578 = vst [vmem:[%s2405_s6 + $0xe0] sm:$0xff] %v1577_v52  ;;  %1580 = vst [vmem:[%s2405_s6 + $0xe8] sm:$0xff] %v1579_v54  ;;  %v1583_v19 = vld [vmem:[%s2409_s8 + $0xf8] sm:$0xff]  ;;  %s3431_s8 = smov %s3326_s15 }
 0x35b   : >> { %1582 = vst [vmem:[%s2405_s6 + $0xf0] sm:$0xff] %v1581_v18  ;;  %1584 = vst [vmem:[%s2405_s6 + $0xf8] sm:$0xff] %v1583_v19  ;;  %s3430_s6 = smov %s1591_s16 }
 0x35c PF: > { %s3367_s17 = sand.u32 31, %s3437_s28   ;;  %s1841_s18 = sshll.u32 %s3259_s5, 8 }
 0x35d   : > { %s1596_s19 = scalar_lea.vmem %s3076_s25, %s1841_s18 [#allocation2]   ;;  %s1598_s20 = scalar_lea.vmem %s3253_s3, %s1841_s18  }
 0x35e   : > { %p1835_p1 = scmp.le.s32.totalorder %s3367_s17, 0 }
 0x35f   : > { %s2419_s21 = smov (!%p1835_p1), %s1598_s20   ;;  %s2423_s22 = smov (!%p1835_p1), %s1596_s19  }
 0x360   : > { %1689 = sbr.rel (%p1835_p1) target bundleno = 877 (0x36d), region = 121  ;;  %s2427_s23 = smov (!%p1835_p1), 0  }
 0x361   : > { %s2431_s24 = smov (!%p1835_p1), 0  }
 0x365 LB: >> { %v1608_v8 = vld [vmem:[%s2425_s22] sm:$0xff]  ;;  %s1610_s26 = sadd.s32 1, %s2429_s23  ;;  %s1602_s24 = sadd.s32 1, %s2433_s24   ;;  %s2433_s24 = sphi %s2431_s24, %s1602_s24   ;;  %s2429_s23 = sphi %s2427_s23, %s2428_s23   ;;  %s2425_s22 = sphi %s2423_s22, %s1615_s22   ;;  %s2421_s21 = sphi %s2419_s21, %s1616_s21  }
 0x366   : >> { %1609 = vst [vmem:[%s2421_s21] sm:$0xff] %v1608_v8  ;;  %p1611_p2 = scmp.ge.s32.totalorder %s1610_s26, %s3367_s17  ;;  %p1601_p3 = scmp.ge.s32.totalorder %s1602_s24, %s3367_s17 }
 0x368   : >> { %s3441_s26 = smov (%p1611_p2, %s1610_s26), 0  ;;  %1604 = sbr.rel (!%p1601_p3) target bundleno = 869 (0x365), region = 127 }
 0x369   : >> { %s1836_s25 = sshll.u32 %s3441_s26, 3  ;;  %s2428_s23 = smov %s3441_s26  }
 0x36a   : >> { %s1615_s22 = scalar_lea.vmem %s1596_s19, %s1836_s25 [#allocation2]   ;;  %s1616_s21 = scalar_lea.vmem %s1598_s20, %s1836_s25  }
 0x36d PF: > { %p8_p4 = scmp.ge.s32.totalorder %s2460_s10, 4   ;;  %s3433_s6 = smov %s2397_s7 }
 0x36e   : > { %s3434_s7 = smov %s2468_s13  ;;  %s3435_s8 = smov %s2460_s10 }
 0x36f   :  { %10 = sbr.rel (!%p8_p4) target bundleno = 2 (0x2), region = 138 }

</bundles_post_ra>
